<compile_context>
chip_gen: v5e
topology: v5e:2x2
jax: 0.10.0
libtpu: 0.0.40
codegen_flags: <defaults>
</compile_context>

<pallas_src>
import jax
import jax.numpy as jnp
import numpy as np
from jax.experimental import pallas as pl
from jax.experimental.pallas import tpu as pltpu

B, C, H, W = 2, 4, 16, 16
CH = C // 2            # half channels (Fm/Gm operate on CH channels)
K = 3                  # conv kernel size (3x3, padding=1 -> "same")
HW = H * W             # 256 — lane-dense flat spatial axis
GUARD = 128            # lane-aligned guard so interior writes are unmasked, |shift| <= W+1
HWP = HW + 2 * GUARD   # padded flat row length
NB = min(B, 8)         # batch rows per block (fills f32 sublanes up to 8)

# Layout invariants the border handling / unmasked interior stores rely on.
assert HW % 128 == 0, "flat spatial axis must be lane-dense (multiple of 128)"
assert GUARD % 128 == 0 and GUARD >= W + 1, "guard must be lane-aligned and cover dy=+-1 shifts"
assert B % NB == 0, "batch must tile evenly into batch blocks"


def _conv3x3_relu(inp, w_ref, b_ref, pad_ref, mask_l, mask_r, nb):
    """ReLU(conv3x3_same(inp)) on flat-H*W slabs.

    inp     : list of CH values, each [nb, HW] f32 (one per input channel)
    w_ref   : SMEM (CH*CH*K*K,) f32, OIHW order
    b_ref   : SMEM (CH,) f32
    pad_ref : VMEM scratch (CH, nb, HWP); guard lanes are zero on entry
    mask_l/r: [nb, HW] bool column masks for the dx = -1 / +1 taps
    returns : list of CH values, each [nb, HW] f32
    """
    # Stage each input channel in its zero-guarded scratch row.
    # Lane-aligned, interior-only store (guards zeroed once in the kernel prologue).
    for ci in range(CH):
        pad_ref[ci, :, pl.ds(GUARD, HW)] = inp[ci]

    # 3 independent partial accumulators per output channel (one per kernel row) so
    # the serial FMA chain depth is CH*K, not CH*K*K. Bias is folded into the row-0
    # accumulator; rows 1..2 are lazily initialised by their first tap.
    part = [[jnp.full((nb, HW), b_ref[co], jnp.float32) if di == 0 else None
             for di in range(K)]
            for co in range(CH)]

    for ci in range(CH):
        # Gather the 9 shifted, border-masked windows for this input channel once;
        # they are reused by every output channel.
        win = []
        for di in range(K):            # dy = di - 1
            row = []
            for dj in range(K):        # dx = dj - 1
                shift = (di - 1) * W + (dj - 1)
                v = pad_ref[ci, :, pl.ds(GUARD + shift, HW)]
                if dj == 0:            # dx = -1: needs w >= 1
                    v = jnp.where(mask_l, v, 0.0)
                elif dj == 2:          # dx = +1: needs w <= W-2
                    v = jnp.where(mask_r, v, 0.0)
                # dy out-of-range taps read the zero guard lanes (no mask needed).
                row.append(v)
            win.append(row)
        for co in range(CH):
            for di in range(K):
                acc = part[co][di]
                for dj in range(K):
                    w = w_ref[((co * CH + ci) * K + di) * K + dj]   # SMEM scalar
                    t = w * win[di][dj]
                    acc = t if acc is None else acc + t
                part[co][di] = acc

    return [jnp.maximum(part[co][0] + part[co][1] + part[co][2], 0.0)
            for co in range(CH)]


def revblock_kernel(x_ref, wf_ref, bf_ref, wg_ref, bg_ref, y_ref, pad_ref):
    nb = x_ref.shape[0]                       # batch rows in this block (= NB)

    # Zero only the guard lanes — the interior is always overwritten before it is
    # read, so re-zeroing it would be pure store traffic. Unconditional (never gated
    # on program_id) so it stays correct if the batch-block axis is sharded across
    # TensorCores (each core has its own scratch instance).
    pad_ref[:, :, :GUARD] = jnp.zeros((CH, nb, GUARD), jnp.float32)
    pad_ref[:, :, GUARD + HW:] = jnp.zeros((CH, nb, GUARD), jnp.float32)

    # Column masks for the W-direction conv borders (hoisted; shared by both convs).
    col = jax.lax.broadcasted_iota(jnp.int32, (nb, HW), 1) % W
    mask_l = col >= 1            # dx = -1 tap valid
    mask_r = col <= W - 2        # dx = +1 tap valid

    x1 = [x_ref[:, ci, :] for ci in range(CH)]
    x2 = [x_ref[:, CH + ci, :] for ci in range(CH)]

    # y1 = x1 + Fm(x2)  — fused in registers, one lane-dense store per channel.
    fm = _conv3x3_relu(x2, wf_ref, bf_ref, pad_ref, mask_l, mask_r, nb)
    y1 = [x1[ci] + fm[ci] for ci in range(CH)]
    for ci in range(CH):
        y_ref[:, ci, :] = y1[ci]

    # y2 = x2 + Gm(y1)  — y1 stays live in registers, never re-read from memory.
    gm = _conv3x3_relu(y1, wg_ref, bg_ref, pad_ref, mask_l, mask_r, nb)
    for ci in range(CH):
        y_ref[:, CH + ci, :] = x2[ci] + gm[ci]


@jax.jit
def reversible_block_forward(x, wf, bf, wg, bg):
    x_flat = x.reshape(B, C, HW)              # lane-dense layout (layout plumbing)
    y_flat = pl.pallas_call(
        revblock_kernel,
        out_shape=jax.ShapeDtypeStruct((B, C, HW), jnp.float32),
        grid=(B // NB,),                      # = (1,) at B=2: whole batch in one block
        in_specs=[
            pl.BlockSpec((NB, C, HW), lambda b: (b, 0, 0)),          # x (VMEM tile)
            pl.BlockSpec(memory_space=pltpu.MemorySpace.SMEM),       # wf (flat)
            pl.BlockSpec(memory_space=pltpu.MemorySpace.SMEM),       # bf
            pl.BlockSpec(memory_space=pltpu.MemorySpace.SMEM),       # wg (flat)
            pl.BlockSpec(memory_space=pltpu.MemorySpace.SMEM),       # bg
        ],
        out_specs=pl.BlockSpec((NB, C, HW), lambda b: (b, 0, 0)),
        scratch_shapes=[pltpu.VMEM((CH, NB, HWP), jnp.float32)],     # zero-guarded conv rows
        compiler_params=pltpu.CompilerParams(
            # Batch-block axis is independent; lets larger B spread over v7x's two
            # TensorCores / megacore. At B=2 the grid is (1,) so it is a no-op.
            dimension_semantics=("parallel",)),
    )(x_flat, wf.reshape(-1), bf, wg.reshape(-1), bg)
    return y_flat.reshape(B, C, H, W)


# ---------------- pure-JAX reference (for correctness check) ----------------
def _conv_ref(x, w, b):
    out = jax.lax.conv_general_dilated(
        x, w, window_strides=(1, 1), padding="SAME",
        dimension_numbers=("NCHW", "OIHW", "NCHW"))
    return jnp.maximum(out + b[None, :, None, None], 0.0)


def revblock_ref(x, wf, bf, wg, bg):
    x1, x2 = x[:, :CH], x[:, CH:]
    y1 = x1 + _conv_ref(x2, wf, bf)
    y2 = x2 + _conv_ref(y1, wg, bg)
    return jnp.concatenate([y1, y2], axis=1)


if __name__ == "__main__":
    key = jax.random.PRNGKey(0)
    kx, kwf, kbf, kwg, kbg = jax.random.split(key, 5)

    x = jax.random.normal(kx, (B, C, H, W), dtype=jnp.float32)
    wf = 0.1 * jax.random.normal(kwf, (CH, CH, K, K), dtype=jnp.float32)
    bf = 0.1 * jax.random.normal(kbf, (CH,), dtype=jnp.float32)
    wg = 0.1 * jax.random.normal(kwg, (CH, CH, K, K), dtype=jnp.float32)
    bg = 0.1 * jax.random.normal(kbg, (CH,), dtype=jnp.float32)

    y = reversible_block_forward(x, wf, bf, wg, bg)
    y = jax.block_until_ready(y)

    y_ref = revblock_ref(x, wf, bf, wg, bg)
    assert y.shape == (B, C, H, W)
    assert np.allclose(np.asarray(y), np.asarray(y_ref), atol=1e-4, rtol=1e-4)

    print("KERNEL_OK")
</pallas_src>

<mosaic_0001>
module attributes {stable_mosaic.version = 11 : i64} {
  func.func @revblock_kernel(%arg0: i32, %arg1: memref<2x4x256xf32, #tpu.memory_space<vmem>>, %arg2: memref<36xf32, #tpu.memory_space<smem>>, %arg3: memref<2xf32, #tpu.memory_space<smem>>, %arg4: memref<36xf32, #tpu.memory_space<smem>>, %arg5: memref<2xf32, #tpu.memory_space<smem>>, %arg6: memref<2x4x256xf32, #tpu.memory_space<vmem>>, %arg7: memref<2x2x512xf32, #tpu.memory_space<vmem>>) attributes {dimension_semantics = [#tpu.dimension_semantics<parallel>], iteration_bounds = array<i64: 1>, scalar_prefetch = 0 : i64, scratch_operands = 1 : i64, tpu.core_type = #tpu.core_type<tc>, window_params = [{transform_indices = @transform_0, window_bounds = array<i64: 2, 4, 256>}, {transform_indices = @transform_1, window_bounds = array<i64: 36>}, {transform_indices = @transform_2, window_bounds = array<i64: 2>}, {transform_indices = @transform_3, window_bounds = array<i64: 36>}, {transform_indices = @transform_4, window_bounds = array<i64: 2>}, {transform_indices = @transform_5, window_bounds = array<i64: 2, 4, 256>}]} {
    %cst = arith.constant 0.000000e+00 : f32
    %0 = vector.broadcast %cst : f32 to vector<2x2x128xf32>
    %c0 = arith.constant 0 : index
    %c0_0 = arith.constant 0 : index
    %c0_1 = arith.constant 0 : index
    %1 = vector.load %arg7[%c0, %c0_0, %c0_1] : memref<2x2x512xf32, #tpu.memory_space<vmem>>, vector<2x2x128xf32>
    tpu.vector_store %arg7[%c0, %c0_0, %c0_1], %0 {strides = array<i32>} : memref<2x2x512xf32, #tpu.memory_space<vmem>>, vector<2x2x128xf32>,
    %cst_2 = arith.constant 0.000000e+00 : f32
    %2 = vector.broadcast %cst_2 : f32 to vector<2x2x128xf32>
    %c0_3 = arith.constant 0 : index
    %c0_4 = arith.constant 0 : index
    %c384 = arith.constant 384 : index
    %3 = vector.load %arg7[%c0_3, %c0_4, %c384] : memref<2x2x512xf32, #tpu.memory_space<vmem>>, vector<2x2x128xf32>
    tpu.vector_store %arg7[%c0_3, %c0_4, %c384], %2 {strides = array<i32>} : memref<2x2x512xf32, #tpu.memory_space<vmem>>, vector<2x2x128xf32>,
    %4 = tpu.iota {dimensions = array<i32: 1>} : vector<2x256xi32>
    %c16_i32 = arith.constant 16 : i32
    %c0_i32 = arith.constant 0 : i32
    %5 = arith.cmpi eq, %c16_i32, %c0_i32 : i32
    %c1_i32 = arith.constant 1 : i32
    %6 = arith.select %5, %c1_i32, %c16_i32 : i32
    %7 = vector.broadcast %6 : i32 to vector<2x256xi32>
    %8 = arith.remsi %4, %7 : vector<2x256xi32>
    %c0_i32_5 = arith.constant 0 : i32
    %9 = vector.broadcast %c0_i32_5 : i32 to vector<2x256xi32>
    %10 = arith.cmpi ne, %8, %9 : vector<2x256xi32>
    %c0_i32_6 = arith.constant 0 : i32
    %11 = vector.broadcast %c0_i32_6 : i32 to vector<2x256xi32>
    %12 = arith.cmpi slt, %8, %11 : vector<2x256xi32>
    %c0_i32_7 = arith.constant 0 : i32
    %13 = arith.cmpi slt, %6, %c0_i32_7 : i32
    %14 = vector.broadcast %13 : i1 to vector<2x256xi1>
    %15 = vector.broadcast %14 : vector<2x256xi1> to vector<2x256xi1>
    %16 = arith.xori %12, %15 : vector<2x256xi1>
    %17 = arith.andi %16, %10 : vector<2x256xi1>
    %18 = vector.broadcast %6 : i32 to vector<2x256xi32>
    %19 = arith.addi %8, %18 : vector<2x256xi32>
    %20 = arith.select %17, %19, %8 : vector<2x256xi1>, vector<2x256xi32>
    %c1_i32_8 = arith.constant 1 : i32
    %21 = vector.broadcast %c1_i32_8 : i32 to vector<2x256xi32>
    %22 = arith.cmpi sge, %20, %21 : vector<2x256xi32>
    %c14_i32 = arith.constant 14 : i32
    %23 = vector.broadcast %c14_i32 : i32 to vector<2x256xi32>
    %24 = arith.cmpi sle, %20, %23 : vector<2x256xi32>
    %c0_9 = arith.constant 0 : index
    %c0_10 = arith.constant 0 : index
    %c0_11 = arith.constant 0 : index
    %25 = vector.load %arg1[%c0_9, %c0_10, %c0_11] : memref<2x4x256xf32, #tpu.memory_space<vmem>>, vector<2x1x256xf32>
    %26 = vector.shape_cast %25 : vector<2x1x256xf32> to vector<2x256xf32>
    %c0_12 = arith.constant 0 : index
    %c1 = arith.constant 1 : index
    %c0_13 = arith.constant 0 : index
    %27 = vector.load %arg1[%c0_12, %c1, %c0_13] : memref<2x4x256xf32, #tpu.memory_space<vmem>>, vector<2x1x256xf32>
    %28 = vector.shape_cast %27 : vector<2x1x256xf32> to vector<2x256xf32>
    %c0_14 = arith.constant 0 : index
    %c2 = arith.constant 2 : index
    %c0_15 = arith.constant 0 : index
    %29 = vector.load %arg1[%c0_14, %c2, %c0_15] : memref<2x4x256xf32, #tpu.memory_space<vmem>>, vector<2x1x256xf32>
    %30 = vector.shape_cast %29 : vector<2x1x256xf32> to vector<2x256xf32>
    %c0_16 = arith.constant 0 : index
    %c3 = arith.constant 3 : index
    %c0_17 = arith.constant 0 : index
    %31 = vector.load %arg1[%c0_16, %c3, %c0_17] : memref<2x4x256xf32, #tpu.memory_space<vmem>>, vector<2x1x256xf32>
    %32 = vector.shape_cast %31 : vector<2x1x256xf32> to vector<2x256xf32>
    %c0_18 = arith.constant 0 : index
    %c0_19 = arith.constant 0 : index
    %c128 = arith.constant 128 : index
    %33 = vector.load %arg7[%c0_18, %c0_19, %c128] : memref<2x2x512xf32, #tpu.memory_space<vmem>>, vector<1x2x256xf32>
    %34 = vector.shape_cast %33 : vector<1x2x256xf32> to vector<2x256xf32>
    %35 = vector.shape_cast %30 : vector<2x256xf32> to vector<1x2x256xf32>
    tpu.vector_store %arg7[%c0_18, %c0_19, %c128], %35 {strides = array<i32>} : memref<2x2x512xf32, #tpu.memory_space<vmem>>, vector<1x2x256xf32>,
    %c1_20 = arith.constant 1 : index
    %c0_21 = arith.constant 0 : index
    %c128_22 = arith.constant 128 : index
    %36 = vector.load %arg7[%c1_20, %c0_21, %c128_22] : memref<2x2x512xf32, #tpu.memory_space<vmem>>, vector<1x2x256xf32>
    %37 = vector.shape_cast %36 : vector<1x2x256xf32> to vector<2x256xf32>
    %38 = vector.shape_cast %32 : vector<2x256xf32> to vector<1x2x256xf32>
    tpu.vector_store %arg7[%c1_20, %c0_21, %c128_22], %38 {strides = array<i32>} : memref<2x2x512xf32, #tpu.memory_space<vmem>>, vector<1x2x256xf32>,
    %c0_23 = arith.constant 0 : index
    %39 = memref.load %arg3[%c0_23] : memref<2xf32, #tpu.memory_space<smem>>
    %40 = vector.broadcast %39 : f32 to vector<2x256xf32>
    %c1_24 = arith.constant 1 : index
    %41 = memref.load %arg3[%c1_24] : memref<2xf32, #tpu.memory_space<smem>>
    %42 = vector.broadcast %41 : f32 to vector<2x256xf32>
    %c0_25 = arith.constant 0 : index
    %c0_26 = arith.constant 0 : index
    %c111 = arith.constant 111 : index
    %43 = vector.load %arg7[%c0_25, %c0_26, %c111] : memref<2x2x512xf32, #tpu.memory_space<vmem>>, vector<1x2x256xf32>
    %44 = vector.shape_cast %43 : vector<1x2x256xf32> to vector<2x256xf32>
    %cst_27 = arith.constant 0.000000e+00 : f32
    %45 = vector.broadcast %cst_27 : f32 to vector<2x256xf32>
    %46 = arith.select %22, %44, %45 : vector<2x256xi1>, vector<2x256xf32>
    %c0_28 = arith.constant 0 : index
    %c0_29 = arith.constant 0 : index
    %c112 = arith.constant 112 : index
    %47 = vector.load %arg7[%c0_28, %c0_29, %c112] : memref<2x2x512xf32, #tpu.memory_space<vmem>>, vector<1x2x256xf32>
    %48 = vector.shape_cast %47 : vector<1x2x256xf32> to vector<2x256xf32>
    %c0_30 = arith.constant 0 : index
    %c0_31 = arith.constant 0 : index
    %c113 = arith.constant 113 : index
    %49 = vector.load %arg7[%c0_30, %c0_31, %c113] : memref<2x2x512xf32, #tpu.memory_space<vmem>>, vector<1x2x256xf32>
    %50 = vector.shape_cast %49 : vector<1x2x256xf32> to vector<2x256xf32>
    %cst_32 = arith.constant 0.000000e+00 : f32
    %51 = vector.broadcast %cst_32 : f32 to vector<2x256xf32>
    %52 = arith.select %24, %50, %51 : vector<2x256xi1>, vector<2x256xf32>
    %c0_33 = arith.constant 0 : index
    %c0_34 = arith.constant 0 : index
    %c127 = arith.constant 127 : index
    %53 = vector.load %arg7[%c0_33, %c0_34, %c127] : memref<2x2x512xf32, #tpu.memory_space<vmem>>, vector<1x2x256xf32>
    %54 = vector.shape_cast %53 : vector<1x2x256xf32> to vector<2x256xf32>
    %cst_35 = arith.constant 0.000000e+00 : f32
    %55 = vector.broadcast %cst_35 : f32 to vector<2x256xf32>
    %56 = arith.select %22, %54, %55 : vector<2x256xi1>, vector<2x256xf32>
    %c0_36 = arith.constant 0 : index
    %c0_37 = arith.constant 0 : index
    %c128_38 = arith.constant 128 : index
    %57 = vector.load %arg7[%c0_36, %c0_37, %c128_38] : memref<2x2x512xf32, #tpu.memory_space<vmem>>, vector<1x2x256xf32>
    %58 = vector.shape_cast %57 : vector<1x2x256xf32> to vector<2x256xf32>
    %c0_39 = arith.constant 0 : index
    %c0_40 = arith.constant 0 : index
    %c129 = arith.constant 129 : index
    %59 = vector.load %arg7[%c0_39, %c0_40, %c129] : memref<2x2x512xf32, #tpu.memory_space<vmem>>, vector<1x2x256xf32>
    %60 = vector.shape_cast %59 : vector<1x2x256xf32> to vector<2x256xf32>
    %cst_41 = arith.constant 0.000000e+00 : f32
    %61 = vector.broadcast %cst_41 : f32 to vector<2x256xf32>
    %62 = arith.select %24, %60, %61 : vector<2x256xi1>, vector<2x256xf32>
    %c0_42 = arith.constant 0 : index
    %c0_43 = arith.constant 0 : index
    %c143 = arith.constant 143 : index
    %63 = vector.load %arg7[%c0_42, %c0_43, %c143] : memref<2x2x512xf32, #tpu.memory_space<vmem>>, vector<1x2x256xf32>
    %64 = vector.shape_cast %63 : vector<1x2x256xf32> to vector<2x256xf32>
    %cst_44 = arith.constant 0.000000e+00 : f32
    %65 = vector.broadcast %cst_44 : f32 to vector<2x256xf32>
    %66 = arith.select %22, %64, %65 : vector<2x256xi1>, vector<2x256xf32>
    %c0_45 = arith.constant 0 : index
    %c0_46 = arith.constant 0 : index
    %c144 = arith.constant 144 : index
    %67 = vector.load %arg7[%c0_45, %c0_46, %c144] : memref<2x2x512xf32, #tpu.memory_space<vmem>>, vector<1x2x256xf32>
    %68 = vector.shape_cast %67 : vector<1x2x256xf32> to vector<2x256xf32>
    %c0_47 = arith.constant 0 : index
    %c0_48 = arith.constant 0 : index
    %c145 = arith.constant 145 : index
    %69 = vector.load %arg7[%c0_47, %c0_48, %c145] : memref<2x2x512xf32, #tpu.memory_space<vmem>>, vector<1x2x256xf32>
    %70 = vector.shape_cast %69 : vector<1x2x256xf32> to vector<2x256xf32>
    %cst_49 = arith.constant 0.000000e+00 : f32
    %71 = vector.broadcast %cst_49 : f32 to vector<2x256xf32>
    %72 = arith.select %24, %70, %71 : vector<2x256xi1>, vector<2x256xf32>
    %c0_50 = arith.constant 0 : index
    %73 = memref.load %arg2[%c0_50] : memref<36xf32, #tpu.memory_space<smem>>
    %74 = vector.broadcast %73 : f32 to vector<2x256xf32>
    %75 = arith.mulf %74, %46 : vector<2x256xf32>
    %76 = arith.addf %40, %75 : vector<2x256xf32>
    %c1_51 = arith.constant 1 : index
    %77 = memref.load %arg2[%c1_51] : memref<36xf32, #tpu.memory_space<smem>>
    %78 = vector.broadcast %77 : f32 to vector<2x256xf32>
    %79 = arith.mulf %78, %48 : vector<2x256xf32>
    %80 = arith.addf %76, %79 : vector<2x256xf32>
    %c2_52 = arith.constant 2 : index
    %81 = memref.load %arg2[%c2_52] : memref<36xf32, #tpu.memory_space<smem>>
    %82 = vector.broadcast %81 : f32 to vector<2x256xf32>
    %83 = arith.mulf %82, %52 : vector<2x256xf32>
    %84 = arith.addf %80, %83 : vector<2x256xf32>
    %c3_53 = arith.constant 3 : index
    %85 = memref.load %arg2[%c3_53] : memref<36xf32, #tpu.memory_space<smem>>
    %86 = vector.broadcast %85 : f32 to vector<2x256xf32>
    %87 = arith.mulf %86, %56 : vector<2x256xf32>
    %c4 = arith.constant 4 : index
    %88 = memref.load %arg2[%c4] : memref<36xf32, #tpu.memory_space<smem>>
    %89 = vector.broadcast %88 : f32 to vector<2x256xf32>
    %90 = arith.mulf %89, %58 : vector<2x256xf32>
    %91 = arith.addf %87, %90 : vector<2x256xf32>
    %c5 = arith.constant 5 : index
    %92 = memref.load %arg2[%c5] : memref<36xf32, #tpu.memory_space<smem>>
    %93 = vector.broadcast %92 : f32 to vector<2x256xf32>
    %94 = arith.mulf %93, %62 : vector<2x256xf32>
    %95 = arith.addf %91, %94 : vector<2x256xf32>
    %c6 = arith.constant 6 : index
    %96 = memref.load %arg2[%c6] : memref<36xf32, #tpu.memory_space<smem>>
    %97 = vector.broadcast %96 : f32 to vector<2x256xf32>
    %98 = arith.mulf %97, %66 : vector<2x256xf32>
    %c7 = arith.constant 7 : index
    %99 = memref.load %arg2[%c7] : memref<36xf32, #tpu.memory_space<smem>>
    %100 = vector.broadcast %99 : f32 to vector<2x256xf32>
    %101 = arith.mulf %100, %68 : vector<2x256xf32>
    %102 = arith.addf %98, %101 : vector<2x256xf32>
    %c8 = arith.constant 8 : index
    %103 = memref.load %arg2[%c8] : memref<36xf32, #tpu.memory_space<smem>>
    %104 = vector.broadcast %103 : f32 to vector<2x256xf32>
    %105 = arith.mulf %104, %72 : vector<2x256xf32>
    %106 = arith.addf %102, %105 : vector<2x256xf32>
    %c18 = arith.constant 18 : index
    %107 = memref.load %arg2[%c18] : memref<36xf32, #tpu.memory_space<smem>>
    %108 = vector.broadcast %107 : f32 to vector<2x256xf32>
    %109 = arith.mulf %108, %46 : vector<2x256xf32>
    %110 = arith.addf %42, %109 : vector<2x256xf32>
    %c19 = arith.constant 19 : index
    %111 = memref.load %arg2[%c19] : memref<36xf32, #tpu.memory_space<smem>>
    %112 = vector.broadcast %111 : f32 to vector<2x256xf32>
    %113 = arith.mulf %112, %48 : vector<2x256xf32>
    %114 = arith.addf %110, %113 : vector<2x256xf32>
    %c20 = arith.constant 20 : index
    %115 = memref.load %arg2[%c20] : memref<36xf32, #tpu.memory_space<smem>>
    %116 = vector.broadcast %115 : f32 to vector<2x256xf32>
    %117 = arith.mulf %116, %52 : vector<2x256xf32>
    %118 = arith.addf %114, %117 : vector<2x256xf32>
    %c21 = arith.constant 21 : index
    %119 = memref.load %arg2[%c21] : memref<36xf32, #tpu.memory_space<smem>>
    %120 = vector.broadcast %119 : f32 to vector<2x256xf32>
    %121 = arith.mulf %120, %56 : vector<2x256xf32>
    %c22 = arith.constant 22 : index
    %122 = memref.load %arg2[%c22] : memref<36xf32, #tpu.memory_space<smem>>
    %123 = vector.broadcast %122 : f32 to vector<2x256xf32>
    %124 = arith.mulf %123, %58 : vector<2x256xf32>
    %125 = arith.addf %121, %124 : vector<2x256xf32>
    %c23 = arith.constant 23 : index
    %126 = memref.load %arg2[%c23] : memref<36xf32, #tpu.memory_space<smem>>
    %127 = vector.broadcast %126 : f32 to vector<2x256xf32>
    %128 = arith.mulf %127, %62 : vector<2x256xf32>
    %129 = arith.addf %125, %128 : vector<2x256xf32>
    %c24 = arith.constant 24 : index
    %130 = memref.load %arg2[%c24] : memref<36xf32, #tpu.memory_space<smem>>
    %131 = vector.broadcast %130 : f32 to vector<2x256xf32>
    %132 = arith.mulf %131, %66 : vector<2x256xf32>
    %c25 = arith.constant 25 : index
    %133 = memref.load %arg2[%c25] : memref<36xf32, #tpu.memory_space<smem>>
    %134 = vector.broadcast %133 : f32 to vector<2x256xf32>
    %135 = arith.mulf %134, %68 : vector<2x256xf32>
    %136 = arith.addf %132, %135 : vector<2x256xf32>
    %c26 = arith.constant 26 : index
    %137 = memref.load %arg2[%c26] : memref<36xf32, #tpu.memory_space<smem>>
    %138 = vector.broadcast %137 : f32 to vector<2x256xf32>
    %139 = arith.mulf %138, %72 : vector<2x256xf32>
    %140 = arith.addf %136, %139 : vector<2x256xf32>
    %c1_54 = arith.constant 1 : index
    %c0_55 = arith.constant 0 : index
    %c111_56 = arith.constant 111 : index
    %141 = vector.load %arg7[%c1_54, %c0_55, %c111_56] : memref<2x2x512xf32, #tpu.memory_space<vmem>>, vector<1x2x256xf32>
    %142 = vector.shape_cast %141 : vector<1x2x256xf32> to vector<2x256xf32>
    %cst_57 = arith.constant 0.000000e+00 : f32
    %143 = vector.broadcast %cst_57 : f32 to vector<2x256xf32>
    %144 = arith.select %22, %142, %143 : vector<2x256xi1>, vector<2x256xf32>
    %c1_58 = arith.constant 1 : index
    %c0_59 = arith.constant 0 : index
    %c112_60 = arith.constant 112 : index
    %145 = vector.load %arg7[%c1_58, %c0_59, %c112_60] : memref<2x2x512xf32, #tpu.memory_space<vmem>>, vector<1x2x256xf32>
    %146 = vector.shape_cast %145 : vector<1x2x256xf32> to vector<2x256xf32>
    %c1_61 = arith.constant 1 : index
    %c0_62 = arith.constant 0 : index
    %c113_63 = arith.constant 113 : index
    %147 = vector.load %arg7[%c1_61, %c0_62, %c113_63] : memref<2x2x512xf32, #tpu.memory_space<vmem>>, vector<1x2x256xf32>
    %148 = vector.shape_cast %147 : vector<1x2x256xf32> to vector<2x256xf32>
    %cst_64 = arith.constant 0.000000e+00 : f32
    %149 = vector.broadcast %cst_64 : f32 to vector<2x256xf32>
    %150 = arith.select %24, %148, %149 : vector<2x256xi1>, vector<2x256xf32>
    %c1_65 = arith.constant 1 : index
    %c0_66 = arith.constant 0 : index
    %c127_67 = arith.constant 127 : index
    %151 = vector.load %arg7[%c1_65, %c0_66, %c127_67] : memref<2x2x512xf32, #tpu.memory_space<vmem>>, vector<1x2x256xf32>
    %152 = vector.shape_cast %151 : vector<1x2x256xf32> to vector<2x256xf32>
    %cst_68 = arith.constant 0.000000e+00 : f32
    %153 = vector.broadcast %cst_68 : f32 to vector<2x256xf32>
    %154 = arith.select %22, %152, %153 : vector<2x256xi1>, vector<2x256xf32>
    %c1_69 = arith.constant 1 : index
    %c0_70 = arith.constant 0 : index
    %c128_71 = arith.constant 128 : index
    %155 = vector.load %arg7[%c1_69, %c0_70, %c128_71] : memref<2x2x512xf32, #tpu.memory_space<vmem>>, vector<1x2x256xf32>
    %156 = vector.shape_cast %155 : vector<1x2x256xf32> to vector<2x256xf32>
    %c1_72 = arith.constant 1 : index
    %c0_73 = arith.constant 0 : index
    %c129_74 = arith.constant 129 : index
    %157 = vector.load %arg7[%c1_72, %c0_73, %c129_74] : memref<2x2x512xf32, #tpu.memory_space<vmem>>, vector<1x2x256xf32>
    %158 = vector.shape_cast %157 : vector<1x2x256xf32> to vector<2x256xf32>
    %cst_75 = arith.constant 0.000000e+00 : f32
    %159 = vector.broadcast %cst_75 : f32 to vector<2x256xf32>
    %160 = arith.select %24, %158, %159 : vector<2x256xi1>, vector<2x256xf32>
    %c1_76 = arith.constant 1 : index
    %c0_77 = arith.constant 0 : index
    %c143_78 = arith.constant 143 : index
    %161 = vector.load %arg7[%c1_76, %c0_77, %c143_78] : memref<2x2x512xf32, #tpu.memory_space<vmem>>, vector<1x2x256xf32>
    %162 = vector.shape_cast %161 : vector<1x2x256xf32> to vector<2x256xf32>
    %cst_79 = arith.constant 0.000000e+00 : f32
    %163 = vector.broadcast %cst_79 : f32 to vector<2x256xf32>
    %164 = arith.select %22, %162, %163 : vector<2x256xi1>, vector<2x256xf32>
    %c1_80 = arith.constant 1 : index
    %c0_81 = arith.constant 0 : index
    %c144_82 = arith.constant 144 : index
    %165 = vector.load %arg7[%c1_80, %c0_81, %c144_82] : memref<2x2x512xf32, #tpu.memory_space<vmem>>, vector<1x2x256xf32>
    %166 = vector.shape_cast %165 : vector<1x2x256xf32> to vector<2x256xf32>
    %c1_83 = arith.constant 1 : index
    %c0_84 = arith.constant 0 : index
    %c145_85 = arith.constant 145 : index
    %167 = vector.load %arg7[%c1_83, %c0_84, %c145_85] : memref<2x2x512xf32, #tpu.memory_space<vmem>>, vector<1x2x256xf32>
    %168 = vector.shape_cast %167 : vector<1x2x256xf32> to vector<2x256xf32>
    %cst_86 = arith.constant 0.000000e+00 : f32
    %169 = vector.broadcast %cst_86 : f32 to vector<2x256xf32>
    %170 = arith.select %24, %168, %169 : vector<2x256xi1>, vector<2x256xf32>
    %c9 = arith.constant 9 : index
    %171 = memref.load %arg2[%c9] : memref<36xf32, #tpu.memory_space<smem>>
    %172 = vector.broadcast %171 : f32 to vector<2x256xf32>
    %173 = arith.mulf %172, %144 : vector<2x256xf32>
    %174 = arith.addf %84, %173 : vector<2x256xf32>
    %c10 = arith.constant 10 : index
    %175 = memref.load %arg2[%c10] : memref<36xf32, #tpu.memory_space<smem>>
    %176 = vector.broadcast %175 : f32 to vector<2x256xf32>
    %177 = arith.mulf %176, %146 : vector<2x256xf32>
    %178 = arith.addf %174, %177 : vector<2x256xf32>
    %c11 = arith.constant 11 : index
    %179 = memref.load %arg2[%c11] : memref<36xf32, #tpu.memory_space<smem>>
    %180 = vector.broadcast %179 : f32 to vector<2x256xf32>
    %181 = arith.mulf %180, %150 : vector<2x256xf32>
    %182 = arith.addf %178, %181 : vector<2x256xf32>
    %c12 = arith.constant 12 : index
    %183 = memref.load %arg2[%c12] : memref<36xf32, #tpu.memory_space<smem>>
    %184 = vector.broadcast %183 : f32 to vector<2x256xf32>
    %185 = arith.mulf %184, %154 : vector<2x256xf32>
    %186 = arith.addf %95, %185 : vector<2x256xf32>
    %c13 = arith.constant 13 : index
    %187 = memref.load %arg2[%c13] : memref<36xf32, #tpu.memory_space<smem>>
    %188 = vector.broadcast %187 : f32 to vector<2x256xf32>
    %189 = arith.mulf %188, %156 : vector<2x256xf32>
    %190 = arith.addf %186, %189 : vector<2x256xf32>
    %c14 = arith.constant 14 : index
    %191 = memref.load %arg2[%c14] : memref<36xf32, #tpu.memory_space<smem>>
    %192 = vector.broadcast %191 : f32 to vector<2x256xf32>
    %193 = arith.mulf %192, %160 : vector<2x256xf32>
    %194 = arith.addf %190, %193 : vector<2x256xf32>
    %c15 = arith.constant 15 : index
    %195 = memref.load %arg2[%c15] : memref<36xf32, #tpu.memory_space<smem>>
    %196 = vector.broadcast %195 : f32 to vector<2x256xf32>
    %197 = arith.mulf %196, %164 : vector<2x256xf32>
    %198 = arith.addf %106, %197 : vector<2x256xf32>
    %c16 = arith.constant 16 : index
    %199 = memref.load %arg2[%c16] : memref<36xf32, #tpu.memory_space<smem>>
    %200 = vector.broadcast %199 : f32 to vector<2x256xf32>
    %201 = arith.mulf %200, %166 : vector<2x256xf32>
    %202 = arith.addf %198, %201 : vector<2x256xf32>
    %c17 = arith.constant 17 : index
    %203 = memref.load %arg2[%c17] : memref<36xf32, #tpu.memory_space<smem>>
    %204 = vector.broadcast %203 : f32 to vector<2x256xf32>
    %205 = arith.mulf %204, %170 : vector<2x256xf32>
    %206 = arith.addf %202, %205 : vector<2x256xf32>
    %c27 = arith.constant 27 : index
    %207 = memref.load %arg2[%c27] : memref<36xf32, #tpu.memory_space<smem>>
    %208 = vector.broadcast %207 : f32 to vector<2x256xf32>
    %209 = arith.mulf %208, %144 : vector<2x256xf32>
    %210 = arith.addf %118, %209 : vector<2x256xf32>
    %c28 = arith.constant 28 : index
    %211 = memref.load %arg2[%c28] : memref<36xf32, #tpu.memory_space<smem>>
    %212 = vector.broadcast %211 : f32 to vector<2x256xf32>
    %213 = arith.mulf %212, %146 : vector<2x256xf32>
    %214 = arith.addf %210, %213 : vector<2x256xf32>
    %c29 = arith.constant 29 : index
    %215 = memref.load %arg2[%c29] : memref<36xf32, #tpu.memory_space<smem>>
    %216 = vector.broadcast %215 : f32 to vector<2x256xf32>
    %217 = arith.mulf %216, %150 : vector<2x256xf32>
    %218 = arith.addf %214, %217 : vector<2x256xf32>
    %c30 = arith.constant 30 : index
    %219 = memref.load %arg2[%c30] : memref<36xf32, #tpu.memory_space<smem>>
    %220 = vector.broadcast %219 : f32 to vector<2x256xf32>
    %221 = arith.mulf %220, %154 : vector<2x256xf32>
    %222 = arith.addf %129, %221 : vector<2x256xf32>
    %c31 = arith.constant 31 : index
    %223 = memref.load %arg2[%c31] : memref<36xf32, #tpu.memory_space<smem>>
    %224 = vector.broadcast %223 : f32 to vector<2x256xf32>
    %225 = arith.mulf %224, %156 : vector<2x256xf32>
    %226 = arith.addf %222, %225 : vector<2x256xf32>
    %c32 = arith.constant 32 : index
    %227 = memref.load %arg2[%c32] : memref<36xf32, #tpu.memory_space<smem>>
    %228 = vector.broadcast %227 : f32 to vector<2x256xf32>
    %229 = arith.mulf %228, %160 : vector<2x256xf32>
    %230 = arith.addf %226, %229 : vector<2x256xf32>
    %c33 = arith.constant 33 : index
    %231 = memref.load %arg2[%c33] : memref<36xf32, #tpu.memory_space<smem>>
    %232 = vector.broadcast %231 : f32 to vector<2x256xf32>
    %233 = arith.mulf %232, %164 : vector<2x256xf32>
    %234 = arith.addf %140, %233 : vector<2x256xf32>
    %c34 = arith.constant 34 : index
    %235 = memref.load %arg2[%c34] : memref<36xf32, #tpu.memory_space<smem>>
    %236 = vector.broadcast %235 : f32 to vector<2x256xf32>
    %237 = arith.mulf %236, %166 : vector<2x256xf32>
    %238 = arith.addf %234, %237 : vector<2x256xf32>
    %c35 = arith.constant 35 : index
    %239 = memref.load %arg2[%c35] : memref<36xf32, #tpu.memory_space<smem>>
    %240 = vector.broadcast %239 : f32 to vector<2x256xf32>
    %241 = arith.mulf %240, %170 : vector<2x256xf32>
    %242 = arith.addf %238, %241 : vector<2x256xf32>
    %243 = arith.addf %182, %194 : vector<2x256xf32>
    %244 = arith.addf %243, %206 : vector<2x256xf32>
    %cst_87 = arith.constant 0.000000e+00 : f32
    %245 = vector.broadcast %cst_87 : f32 to vector<2x256xf32>
    %246 = arith.maximumf %244, %245 : vector<2x256xf32>
    %247 = arith.addf %218, %230 : vector<2x256xf32>
    %248 = arith.addf %247, %242 : vector<2x256xf32>
    %cst_88 = arith.constant 0.000000e+00 : f32
    %249 = vector.broadcast %cst_88 : f32 to vector<2x256xf32>
    %250 = arith.maximumf %248, %249 : vector<2x256xf32>
    %251 = arith.addf %26, %246 : vector<2x256xf32>
    %252 = arith.addf %28, %250 : vector<2x256xf32>
    %c0_89 = arith.constant 0 : index
    %c0_90 = arith.constant 0 : index
    %c0_91 = arith.constant 0 : index
    %253 = vector.load %arg6[%c0_89, %c0_90, %c0_91] : memref<2x4x256xf32, #tpu.memory_space<vmem>>, vector<2x1x256xf32>
    %254 = vector.shape_cast %253 : vector<2x1x256xf32> to vector<2x256xf32>
    %255 = vector.shape_cast %251 : vector<2x256xf32> to vector<2x1x256xf32>
    tpu.vector_store %arg6[%c0_89, %c0_90, %c0_91], %255 {strides = array<i32>} : memref<2x4x256xf32, #tpu.memory_space<vmem>>, vector<2x1x256xf32>,
    %c0_92 = arith.constant 0 : index
    %c1_93 = arith.constant 1 : index
    %c0_94 = arith.constant 0 : index
    %256 = vector.load %arg6[%c0_92, %c1_93, %c0_94] : memref<2x4x256xf32, #tpu.memory_space<vmem>>, vector<2x1x256xf32>
    %257 = vector.shape_cast %256 : vector<2x1x256xf32> to vector<2x256xf32>
    %258 = vector.shape_cast %252 : vector<2x256xf32> to vector<2x1x256xf32>
    tpu.vector_store %arg6[%c0_92, %c1_93, %c0_94], %258 {strides = array<i32>} : memref<2x4x256xf32, #tpu.memory_space<vmem>>, vector<2x1x256xf32>,
    %c0_95 = arith.constant 0 : index
    %c0_96 = arith.constant 0 : index
    %c128_97 = arith.constant 128 : index
    %259 = vector.load %arg7[%c0_95, %c0_96, %c128_97] : memref<2x2x512xf32, #tpu.memory_space<vmem>>, vector<1x2x256xf32>
    %260 = vector.shape_cast %259 : vector<1x2x256xf32> to vector<2x256xf32>
    %261 = vector.shape_cast %251 : vector<2x256xf32> to vector<1x2x256xf32>
    tpu.vector_store %arg7[%c0_95, %c0_96, %c128_97], %261 {strides = array<i32>} : memref<2x2x512xf32, #tpu.memory_space<vmem>>, vector<1x2x256xf32>,
    %c1_98 = arith.constant 1 : index
    %c0_99 = arith.constant 0 : index
    %c128_100 = arith.constant 128 : index
    %262 = vector.load %arg7[%c1_98, %c0_99, %c128_100] : memref<2x2x512xf32, #tpu.memory_space<vmem>>, vector<1x2x256xf32>
    %263 = vector.shape_cast %262 : vector<1x2x256xf32> to vector<2x256xf32>
    %264 = vector.shape_cast %252 : vector<2x256xf32> to vector<1x2x256xf32>
    tpu.vector_store %arg7[%c1_98, %c0_99, %c128_100], %264 {strides = array<i32>} : memref<2x2x512xf32, #tpu.memory_space<vmem>>, vector<1x2x256xf32>,
    %c0_101 = arith.constant 0 : index
    %265 = memref.load %arg5[%c0_101] : memref<2xf32, #tpu.memory_space<smem>>
    %266 = vector.broadcast %265 : f32 to vector<2x256xf32>
    %c1_102 = arith.constant 1 : index
    %267 = memref.load %arg5[%c1_102] : memref<2xf32, #tpu.memory_space<smem>>
    %268 = vector.broadcast %267 : f32 to vector<2x256xf32>
    %c0_103 = arith.constant 0 : index
    %c0_104 = arith.constant 0 : index
    %c111_105 = arith.constant 111 : index
    %269 = vector.load %arg7[%c0_103, %c0_104, %c111_105] : memref<2x2x512xf32, #tpu.memory_space<vmem>>, vector<1x2x256xf32>
    %270 = vector.shape_cast %269 : vector<1x2x256xf32> to vector<2x256xf32>
    %cst_106 = arith.constant 0.000000e+00 : f32
    %271 = vector.broadcast %cst_106 : f32 to vector<2x256xf32>
    %272 = arith.select %22, %270, %271 : vector<2x256xi1>, vector<2x256xf32>
    %c0_107 = arith.constant 0 : index
    %c0_108 = arith.constant 0 : index
    %c112_109 = arith.constant 112 : index
    %273 = vector.load %arg7[%c0_107, %c0_108, %c112_109] : memref<2x2x512xf32, #tpu.memory_space<vmem>>, vector<1x2x256xf32>
    %274 = vector.shape_cast %273 : vector<1x2x256xf32> to vector<2x256xf32>
    %c0_110 = arith.constant 0 : index
    %c0_111 = arith.constant 0 : index
    %c113_112 = arith.constant 113 : index
    %275 = vector.load %arg7[%c0_110, %c0_111, %c113_112] : memref<2x2x512xf32, #tpu.memory_space<vmem>>, vector<1x2x256xf32>
    %276 = vector.shape_cast %275 : vector<1x2x256xf32> to vector<2x256xf32>
    %cst_113 = arith.constant 0.000000e+00 : f32
    %277 = vector.broadcast %cst_113 : f32 to vector<2x256xf32>
    %278 = arith.select %24, %276, %277 : vector<2x256xi1>, vector<2x256xf32>
    %c0_114 = arith.constant 0 : index
    %c0_115 = arith.constant 0 : index
    %c127_116 = arith.constant 127 : index
    %279 = vector.load %arg7[%c0_114, %c0_115, %c127_116] : memref<2x2x512xf32, #tpu.memory_space<vmem>>, vector<1x2x256xf32>
    %280 = vector.shape_cast %279 : vector<1x2x256xf32> to vector<2x256xf32>
    %cst_117 = arith.constant 0.000000e+00 : f32
    %281 = vector.broadcast %cst_117 : f32 to vector<2x256xf32>
    %282 = arith.select %22, %280, %281 : vector<2x256xi1>, vector<2x256xf32>
    %c0_118 = arith.constant 0 : index
    %c0_119 = arith.constant 0 : index
    %c128_120 = arith.constant 128 : index
    %283 = vector.load %arg7[%c0_118, %c0_119, %c128_120] : memref<2x2x512xf32, #tpu.memory_space<vmem>>, vector<1x2x256xf32>
    %284 = vector.shape_cast %283 : vector<1x2x256xf32> to vector<2x256xf32>
    %c0_121 = arith.constant 0 : index
    %c0_122 = arith.constant 0 : index
    %c129_123 = arith.constant 129 : index
    %285 = vector.load %arg7[%c0_121, %c0_122, %c129_123] : memref<2x2x512xf32, #tpu.memory_space<vmem>>, vector<1x2x256xf32>
    %286 = vector.shape_cast %285 : vector<1x2x256xf32> to vector<2x256xf32>
    %cst_124 = arith.constant 0.000000e+00 : f32
    %287 = vector.broadcast %cst_124 : f32 to vector<2x256xf32>
    %288 = arith.select %24, %286, %287 : vector<2x256xi1>, vector<2x256xf32>
    %c0_125 = arith.constant 0 : index
    %c0_126 = arith.constant 0 : index
    %c143_127 = arith.constant 143 : index
    %289 = vector.load %arg7[%c0_125, %c0_126, %c143_127] : memref<2x2x512xf32, #tpu.memory_space<vmem>>, vector<1x2x256xf32>
    %290 = vector.shape_cast %289 : vector<1x2x256xf32> to vector<2x256xf32>
    %cst_128 = arith.constant 0.000000e+00 : f32
    %291 = vector.broadcast %cst_128 : f32 to vector<2x256xf32>
    %292 = arith.select %22, %290, %291 : vector<2x256xi1>, vector<2x256xf32>
    %c0_129 = arith.constant 0 : index
    %c0_130 = arith.constant 0 : index
    %c144_131 = arith.constant 144 : index
    %293 = vector.load %arg7[%c0_129, %c0_130, %c144_131] : memref<2x2x512xf32, #tpu.memory_space<vmem>>, vector<1x2x256xf32>
    %294 = vector.shape_cast %293 : vector<1x2x256xf32> to vector<2x256xf32>
    %c0_132 = arith.constant 0 : index
    %c0_133 = arith.constant 0 : index
    %c145_134 = arith.constant 145 : index
    %295 = vector.load %arg7[%c0_132, %c0_133, %c145_134] : memref<2x2x512xf32, #tpu.memory_space<vmem>>, vector<1x2x256xf32>
    %296 = vector.shape_cast %295 : vector<1x2x256xf32> to vector<2x256xf32>
    %cst_135 = arith.constant 0.000000e+00 : f32
    %297 = vector.broadcast %cst_135 : f32 to vector<2x256xf32>
    %298 = arith.select %24, %296, %297 : vector<2x256xi1>, vector<2x256xf32>
    %c0_136 = arith.constant 0 : index
    %299 = memref.load %arg4[%c0_136] : memref<36xf32, #tpu.memory_space<smem>>
    %300 = vector.broadcast %299 : f32 to vector<2x256xf32>
    %301 = arith.mulf %300, %272 : vector<2x256xf32>
    %302 = arith.addf %266, %301 : vector<2x256xf32>
    %c1_137 = arith.constant 1 : index
    %303 = memref.load %arg4[%c1_137] : memref<36xf32, #tpu.memory_space<smem>>
    %304 = vector.broadcast %303 : f32 to vector<2x256xf32>
    %305 = arith.mulf %304, %274 : vector<2x256xf32>
    %306 = arith.addf %302, %305 : vector<2x256xf32>
    %c2_138 = arith.constant 2 : index
    %307 = memref.load %arg4[%c2_138] : memref<36xf32, #tpu.memory_space<smem>>
    %308 = vector.broadcast %307 : f32 to vector<2x256xf32>
    %309 = arith.mulf %308, %278 : vector<2x256xf32>
    %310 = arith.addf %306, %309 : vector<2x256xf32>
    %c3_139 = arith.constant 3 : index
    %311 = memref.load %arg4[%c3_139] : memref<36xf32, #tpu.memory_space<smem>>
    %312 = vector.broadcast %311 : f32 to vector<2x256xf32>
    %313 = arith.mulf %312, %282 : vector<2x256xf32>
    %c4_140 = arith.constant 4 : index
    %314 = memref.load %arg4[%c4_140] : memref<36xf32, #tpu.memory_space<smem>>
    %315 = vector.broadcast %314 : f32 to vector<2x256xf32>
    %316 = arith.mulf %315, %284 : vector<2x256xf32>
    %317 = arith.addf %313, %316 : vector<2x256xf32>
    %c5_141 = arith.constant 5 : index
    %318 = memref.load %arg4[%c5_141] : memref<36xf32, #tpu.memory_space<smem>>
    %319 = vector.broadcast %318 : f32 to vector<2x256xf32>
    %320 = arith.mulf %319, %288 : vector<2x256xf32>
    %321 = arith.addf %317, %320 : vector<2x256xf32>
    %c6_142 = arith.constant 6 : index
    %322 = memref.load %arg4[%c6_142] : memref<36xf32, #tpu.memory_space<smem>>
    %323 = vector.broadcast %322 : f32 to vector<2x256xf32>
    %324 = arith.mulf %323, %292 : vector<2x256xf32>
    %c7_143 = arith.constant 7 : index
    %325 = memref.load %arg4[%c7_143] : memref<36xf32, #tpu.memory_space<smem>>
    %326 = vector.broadcast %325 : f32 to vector<2x256xf32>
    %327 = arith.mulf %326, %294 : vector<2x256xf32>
    %328 = arith.addf %324, %327 : vector<2x256xf32>
    %c8_144 = arith.constant 8 : index
    %329 = memref.load %arg4[%c8_144] : memref<36xf32, #tpu.memory_space<smem>>
    %330 = vector.broadcast %329 : f32 to vector<2x256xf32>
    %331 = arith.mulf %330, %298 : vector<2x256xf32>
    %332 = arith.addf %328, %331 : vector<2x256xf32>
    %c18_145 = arith.constant 18 : index
    %333 = memref.load %arg4[%c18_145] : memref<36xf32, #tpu.memory_space<smem>>
    %334 = vector.broadcast %333 : f32 to vector<2x256xf32>
    %335 = arith.mulf %334, %272 : vector<2x256xf32>
    %336 = arith.addf %268, %335 : vector<2x256xf32>
    %c19_146 = arith.constant 19 : index
    %337 = memref.load %arg4[%c19_146] : memref<36xf32, #tpu.memory_space<smem>>
    %338 = vector.broadcast %337 : f32 to vector<2x256xf32>
    %339 = arith.mulf %338, %274 : vector<2x256xf32>
    %340 = arith.addf %336, %339 : vector<2x256xf32>
    %c20_147 = arith.constant 20 : index
    %341 = memref.load %arg4[%c20_147] : memref<36xf32, #tpu.memory_space<smem>>
    %342 = vector.broadcast %341 : f32 to vector<2x256xf32>
    %343 = arith.mulf %342, %278 : vector<2x256xf32>
    %344 = arith.addf %340, %343 : vector<2x256xf32>
    %c21_148 = arith.constant 21 : index
    %345 = memref.load %arg4[%c21_148] : memref<36xf32, #tpu.memory_space<smem>>
    %346 = vector.broadcast %345 : f32 to vector<2x256xf32>
    %347 = arith.mulf %346, %282 : vector<2x256xf32>
    %c22_149 = arith.constant 22 : index
    %348 = memref.load %arg4[%c22_149] : memref<36xf32, #tpu.memory_space<smem>>
    %349 = vector.broadcast %348 : f32 to vector<2x256xf32>
    %350 = arith.mulf %349, %284 : vector<2x256xf32>
    %351 = arith.addf %347, %350 : vector<2x256xf32>
    %c23_150 = arith.constant 23 : index
    %352 = memref.load %arg4[%c23_150] : memref<36xf32, #tpu.memory_space<smem>>
    %353 = vector.broadcast %352 : f32 to vector<2x256xf32>
    %354 = arith.mulf %353, %288 : vector<2x256xf32>
    %355 = arith.addf %351, %354 : vector<2x256xf32>
    %c24_151 = arith.constant 24 : index
    %356 = memref.load %arg4[%c24_151] : memref<36xf32, #tpu.memory_space<smem>>
    %357 = vector.broadcast %356 : f32 to vector<2x256xf32>
    %358 = arith.mulf %357, %292 : vector<2x256xf32>
    %c25_152 = arith.constant 25 : index
    %359 = memref.load %arg4[%c25_152] : memref<36xf32, #tpu.memory_space<smem>>
    %360 = vector.broadcast %359 : f32 to vector<2x256xf32>
    %361 = arith.mulf %360, %294 : vector<2x256xf32>
    %362 = arith.addf %358, %361 : vector<2x256xf32>
    %c26_153 = arith.constant 26 : index
    %363 = memref.load %arg4[%c26_153] : memref<36xf32, #tpu.memory_space<smem>>
    %364 = vector.broadcast %363 : f32 to vector<2x256xf32>
    %365 = arith.mulf %364, %298 : vector<2x256xf32>
    %366 = arith.addf %362, %365 : vector<2x256xf32>
    %c1_154 = arith.constant 1 : index
    %c0_155 = arith.constant 0 : index
    %c111_156 = arith.constant 111 : index
    %367 = vector.load %arg7[%c1_154, %c0_155, %c111_156] : memref<2x2x512xf32, #tpu.memory_space<vmem>>, vector<1x2x256xf32>
    %368 = vector.shape_cast %367 : vector<1x2x256xf32> to vector<2x256xf32>
    %cst_157 = arith.constant 0.000000e+00 : f32
    %369 = vector.broadcast %cst_157 : f32 to vector<2x256xf32>
    %370 = arith.select %22, %368, %369 : vector<2x256xi1>, vector<2x256xf32>
    %c1_158 = arith.constant 1 : index
    %c0_159 = arith.constant 0 : index
    %c112_160 = arith.constant 112 : index
    %371 = vector.load %arg7[%c1_158, %c0_159, %c112_160] : memref<2x2x512xf32, #tpu.memory_space<vmem>>, vector<1x2x256xf32>
    %372 = vector.shape_cast %371 : vector<1x2x256xf32> to vector<2x256xf32>
    %c1_161 = arith.constant 1 : index
    %c0_162 = arith.constant 0 : index
    %c113_163 = arith.constant 113 : index
    %373 = vector.load %arg7[%c1_161, %c0_162, %c113_163] : memref<2x2x512xf32, #tpu.memory_space<vmem>>, vector<1x2x256xf32>
    %374 = vector.shape_cast %373 : vector<1x2x256xf32> to vector<2x256xf32>
    %cst_164 = arith.constant 0.000000e+00 : f32
    %375 = vector.broadcast %cst_164 : f32 to vector<2x256xf32>
    %376 = arith.select %24, %374, %375 : vector<2x256xi1>, vector<2x256xf32>
    %c1_165 = arith.constant 1 : index
    %c0_166 = arith.constant 0 : index
    %c127_167 = arith.constant 127 : index
    %377 = vector.load %arg7[%c1_165, %c0_166, %c127_167] : memref<2x2x512xf32, #tpu.memory_space<vmem>>, vector<1x2x256xf32>
    %378 = vector.shape_cast %377 : vector<1x2x256xf32> to vector<2x256xf32>
    %cst_168 = arith.constant 0.000000e+00 : f32
    %379 = vector.broadcast %cst_168 : f32 to vector<2x256xf32>
    %380 = arith.select %22, %378, %379 : vector<2x256xi1>, vector<2x256xf32>
    %c1_169 = arith.constant 1 : index
    %c0_170 = arith.constant 0 : index
    %c128_171 = arith.constant 128 : index
    %381 = vector.load %arg7[%c1_169, %c0_170, %c128_171] : memref<2x2x512xf32, #tpu.memory_space<vmem>>, vector<1x2x256xf32>
    %382 = vector.shape_cast %381 : vector<1x2x256xf32> to vector<2x256xf32>
    %c1_172 = arith.constant 1 : index
    %c0_173 = arith.constant 0 : index
    %c129_174 = arith.constant 129 : index
    %383 = vector.load %arg7[%c1_172, %c0_173, %c129_174] : memref<2x2x512xf32, #tpu.memory_space<vmem>>, vector<1x2x256xf32>
    %384 = vector.shape_cast %383 : vector<1x2x256xf32> to vector<2x256xf32>
    %cst_175 = arith.constant 0.000000e+00 : f32
    %385 = vector.broadcast %cst_175 : f32 to vector<2x256xf32>
    %386 = arith.select %24, %384, %385 : vector<2x256xi1>, vector<2x256xf32>
    %c1_176 = arith.constant 1 : index
    %c0_177 = arith.constant 0 : index
    %c143_178 = arith.constant 143 : index
    %387 = vector.load %arg7[%c1_176, %c0_177, %c143_178] : memref<2x2x512xf32, #tpu.memory_space<vmem>>, vector<1x2x256xf32>
    %388 = vector.shape_cast %387 : vector<1x2x256xf32> to vector<2x256xf32>
    %cst_179 = arith.constant 0.000000e+00 : f32
    %389 = vector.broadcast %cst_179 : f32 to vector<2x256xf32>
    %390 = arith.select %22, %388, %389 : vector<2x256xi1>, vector<2x256xf32>
    %c1_180 = arith.constant 1 : index
    %c0_181 = arith.constant 0 : index
    %c144_182 = arith.constant 144 : index
    %391 = vector.load %arg7[%c1_180, %c0_181, %c144_182] : memref<2x2x512xf32, #tpu.memory_space<vmem>>, vector<1x2x256xf32>
    %392 = vector.shape_cast %391 : vector<1x2x256xf32> to vector<2x256xf32>
    %c1_183 = arith.constant 1 : index
    %c0_184 = arith.constant 0 : index
    %c145_185 = arith.constant 145 : index
    %393 = vector.load %arg7[%c1_183, %c0_184, %c145_185] : memref<2x2x512xf32, #tpu.memory_space<vmem>>, vector<1x2x256xf32>
    %394 = vector.shape_cast %393 : vector<1x2x256xf32> to vector<2x256xf32>
    %cst_186 = arith.constant 0.000000e+00 : f32
    %395 = vector.broadcast %cst_186 : f32 to vector<2x256xf32>
    %396 = arith.select %24, %394, %395 : vector<2x256xi1>, vector<2x256xf32>
    %c9_187 = arith.constant 9 : index
    %397 = memref.load %arg4[%c9_187] : memref<36xf32, #tpu.memory_space<smem>>
    %398 = vector.broadcast %397 : f32 to vector<2x256xf32>
    %399 = arith.mulf %398, %370 : vector<2x256xf32>
    %400 = arith.addf %310, %399 : vector<2x256xf32>
    %c10_188 = arith.constant 10 : index
    %401 = memref.load %arg4[%c10_188] : memref<36xf32, #tpu.memory_space<smem>>
    %402 = vector.broadcast %401 : f32 to vector<2x256xf32>
    %403 = arith.mulf %402, %372 : vector<2x256xf32>
    %404 = arith.addf %400, %403 : vector<2x256xf32>
    %c11_189 = arith.constant 11 : index
    %405 = memref.load %arg4[%c11_189] : memref<36xf32, #tpu.memory_space<smem>>
    %406 = vector.broadcast %405 : f32 to vector<2x256xf32>
    %407 = arith.mulf %406, %376 : vector<2x256xf32>
    %408 = arith.addf %404, %407 : vector<2x256xf32>
    %c12_190 = arith.constant 12 : index
    %409 = memref.load %arg4[%c12_190] : memref<36xf32, #tpu.memory_space<smem>>
    %410 = vector.broadcast %409 : f32 to vector<2x256xf32>
    %411 = arith.mulf %410, %380 : vector<2x256xf32>
    %412 = arith.addf %321, %411 : vector<2x256xf32>
    %c13_191 = arith.constant 13 : index
    %413 = memref.load %arg4[%c13_191] : memref<36xf32, #tpu.memory_space<smem>>
    %414 = vector.broadcast %413 : f32 to vector<2x256xf32>
    %415 = arith.mulf %414, %382 : vector<2x256xf32>
    %416 = arith.addf %412, %415 : vector<2x256xf32>
    %c14_192 = arith.constant 14 : index
    %417 = memref.load %arg4[%c14_192] : memref<36xf32, #tpu.memory_space<smem>>
    %418 = vector.broadcast %417 : f32 to vector<2x256xf32>
    %419 = arith.mulf %418, %386 : vector<2x256xf32>
    %420 = arith.addf %416, %419 : vector<2x256xf32>
    %c15_193 = arith.constant 15 : index
    %421 = memref.load %arg4[%c15_193] : memref<36xf32, #tpu.memory_space<smem>>
    %422 = vector.broadcast %421 : f32 to vector<2x256xf32>
    %423 = arith.mulf %422, %390 : vector<2x256xf32>
    %424 = arith.addf %332, %423 : vector<2x256xf32>
    %c16_194 = arith.constant 16 : index
    %425 = memref.load %arg4[%c16_194] : memref<36xf32, #tpu.memory_space<smem>>
    %426 = vector.broadcast %425 : f32 to vector<2x256xf32>
    %427 = arith.mulf %426, %392 : vector<2x256xf32>
    %428 = arith.addf %424, %427 : vector<2x256xf32>
    %c17_195 = arith.constant 17 : index
    %429 = memref.load %arg4[%c17_195] : memref<36xf32, #tpu.memory_space<smem>>
    %430 = vector.broadcast %429 : f32 to vector<2x256xf32>
    %431 = arith.mulf %430, %396 : vector<2x256xf32>
    %432 = arith.addf %428, %431 : vector<2x256xf32>
    %c27_196 = arith.constant 27 : index
    %433 = memref.load %arg4[%c27_196] : memref<36xf32, #tpu.memory_space<smem>>
    %434 = vector.broadcast %433 : f32 to vector<2x256xf32>
    %435 = arith.mulf %434, %370 : vector<2x256xf32>
    %436 = arith.addf %344, %435 : vector<2x256xf32>
    %c28_197 = arith.constant 28 : index
    %437 = memref.load %arg4[%c28_197] : memref<36xf32, #tpu.memory_space<smem>>
    %438 = vector.broadcast %437 : f32 to vector<2x256xf32>
    %439 = arith.mulf %438, %372 : vector<2x256xf32>
    %440 = arith.addf %436, %439 : vector<2x256xf32>
    %c29_198 = arith.constant 29 : index
    %441 = memref.load %arg4[%c29_198] : memref<36xf32, #tpu.memory_space<smem>>
    %442 = vector.broadcast %441 : f32 to vector<2x256xf32>
    %443 = arith.mulf %442, %376 : vector<2x256xf32>
    %444 = arith.addf %440, %443 : vector<2x256xf32>
    %c30_199 = arith.constant 30 : index
    %445 = memref.load %arg4[%c30_199] : memref<36xf32, #tpu.memory_space<smem>>
    %446 = vector.broadcast %445 : f32 to vector<2x256xf32>
    %447 = arith.mulf %446, %380 : vector<2x256xf32>
    %448 = arith.addf %355, %447 : vector<2x256xf32>
    %c31_200 = arith.constant 31 : index
    %449 = memref.load %arg4[%c31_200] : memref<36xf32, #tpu.memory_space<smem>>
    %450 = vector.broadcast %449 : f32 to vector<2x256xf32>
    %451 = arith.mulf %450, %382 : vector<2x256xf32>
    %452 = arith.addf %448, %451 : vector<2x256xf32>
    %c32_201 = arith.constant 32 : index
    %453 = memref.load %arg4[%c32_201] : memref<36xf32, #tpu.memory_space<smem>>
    %454 = vector.broadcast %453 : f32 to vector<2x256xf32>
    %455 = arith.mulf %454, %386 : vector<2x256xf32>
    %456 = arith.addf %452, %455 : vector<2x256xf32>
    %c33_202 = arith.constant 33 : index
    %457 = memref.load %arg4[%c33_202] : memref<36xf32, #tpu.memory_space<smem>>
    %458 = vector.broadcast %457 : f32 to vector<2x256xf32>
    %459 = arith.mulf %458, %390 : vector<2x256xf32>
    %460 = arith.addf %366, %459 : vector<2x256xf32>
    %c34_203 = arith.constant 34 : index
    %461 = memref.load %arg4[%c34_203] : memref<36xf32, #tpu.memory_space<smem>>
    %462 = vector.broadcast %461 : f32 to vector<2x256xf32>
    %463 = arith.mulf %462, %392 : vector<2x256xf32>
    %464 = arith.addf %460, %463 : vector<2x256xf32>
    %c35_204 = arith.constant 35 : index
    %465 = memref.load %arg4[%c35_204] : memref<36xf32, #tpu.memory_space<smem>>
    %466 = vector.broadcast %465 : f32 to vector<2x256xf32>
    %467 = arith.mulf %466, %396 : vector<2x256xf32>
    %468 = arith.addf %464, %467 : vector<2x256xf32>
    %469 = arith.addf %408, %420 : vector<2x256xf32>
    %470 = arith.addf %469, %432 : vector<2x256xf32>
    %cst_205 = arith.constant 0.000000e+00 : f32
    %471 = vector.broadcast %cst_205 : f32 to vector<2x256xf32>
    %472 = arith.maximumf %470, %471 : vector<2x256xf32>
    %473 = arith.addf %444, %456 : vector<2x256xf32>
    %474 = arith.addf %473, %468 : vector<2x256xf32>
    %cst_206 = arith.constant 0.000000e+00 : f32
    %475 = vector.broadcast %cst_206 : f32 to vector<2x256xf32>
    %476 = arith.maximumf %474, %475 : vector<2x256xf32>
    %477 = arith.addf %30, %472 : vector<2x256xf32>
    %c0_207 = arith.constant 0 : index
    %c2_208 = arith.constant 2 : index
    %c0_209 = arith.constant 0 : index
    %478 = vector.load %arg6[%c0_207, %c2_208, %c0_209] : memref<2x4x256xf32, #tpu.memory_space<vmem>>, vector<2x1x256xf32>
    %479 = vector.shape_cast %478 : vector<2x1x256xf32> to vector<2x256xf32>
    %480 = vector.shape_cast %477 : vector<2x256xf32> to vector<2x1x256xf32>
    tpu.vector_store %arg6[%c0_207, %c2_208, %c0_209], %480 {strides = array<i32>} : memref<2x4x256xf32, #tpu.memory_space<vmem>>, vector<2x1x256xf32>,
    %481 = arith.addf %32, %476 : vector<2x256xf32>
    %c0_210 = arith.constant 0 : index
    %c3_211 = arith.constant 3 : index
    %c0_212 = arith.constant 0 : index
    %482 = vector.load %arg6[%c0_210, %c3_211, %c0_212] : memref<2x4x256xf32, #tpu.memory_space<vmem>>, vector<2x1x256xf32>
    %483 = vector.shape_cast %482 : vector<2x1x256xf32> to vector<2x256xf32>
    %484 = vector.shape_cast %481 : vector<2x256xf32> to vector<2x1x256xf32>
    tpu.vector_store %arg6[%c0_210, %c3_211, %c0_212], %484 {strides = array<i32>} : memref<2x4x256xf32, #tpu.memory_space<vmem>>, vector<2x1x256xf32>,
    return
  }
  func.func @transform_0(%arg0: i32) -> (i32, i32, i32) {
    %c0_i32 = arith.constant 0 : i32
    %c0_i32_0 = arith.constant 0 : i32
    %c0_i32_1 = arith.constant 0 : i32
    return %arg0, %c0_i32, %c0_i32_0 : i32, i32, i32
  }
  func.func @transform_1(%arg0: i32) -> i32 {
    %c0_i32 = arith.constant 0 : i32
    %c0_i32_0 = arith.constant 0 : i32
    return %c0_i32 : i32
  }
  func.func @transform_2(%arg0: i32) -> i32 {
    %c0_i32 = arith.constant 0 : i32
    %c0_i32_0 = arith.constant 0 : i32
    return %c0_i32 : i32
  }
  func.func @transform_3(%arg0: i32) -> i32 {
    %c0_i32 = arith.constant 0 : i32
    %c0_i32_0 = arith.constant 0 : i32
    return %c0_i32 : i32
  }
  func.func @transform_4(%arg0: i32) -> i32 {
    %c0_i32 = arith.constant 0 : i32
    %c0_i32_0 = arith.constant 0 : i32
    return %c0_i32 : i32
  }
  func.func @transform_5(%arg0: i32) -> (i32, i32, i32) {
    %c0_i32 = arith.constant 0 : i32
    %c0_i32_0 = arith.constant 0 : i32
    %c0_i32_1 = arith.constant 0 : i32
    return %arg0, %c0_i32, %c0_i32_0 : i32, i32, i32
  }
}

</mosaic_0001>

<bundles_post_ra>
// kernel: reversible_block_forward.1
= control target key start
LH: loop header
LB: loop body
LE: loop exit
PB: predicated region body
PF: predicated region fallthrough
CT: control target
= control target key end

     0   :  { %10 = vsyncpa [#allocation4], 0  ;;  %s2442_s0 = inlined_call_operand.vmem [shape: f32[2,4,256], index: 0, kind: input, shape index: {}]   ;;  %s2443_s1 = inlined_call_operand.vmem [shape: f32[36], index: 1, kind: input, shape index: {}]   ;;  %s2444_s2 = inlined_call_operand.vmem [shape: f32[2], index: 2, kind: input, shape index: {}]   ;;  %s2445_s3 = inlined_call_operand.vmem [shape: f32[36], index: 3, kind: input, shape index: {}]   ;;  %s2446_s4 = inlined_call_operand.vmem [shape: f32[2], index: 4, kind: input, shape index: {}]   ;;  %s2447_s5 = inlined_call_operand.vmem [shape: f32[2,4,256], index: 5, kind: output, shape index: {}]  }
   0x1   :  { %11 = vsyncpa [#allocation6], 0  ;;  %s29_s20 = sshll.u32 %s2444_s2, 4  ;;  %s30_s20 = int_to_ptr.vmem [resolvable:$true] %s29_s20 }
   0x2   :  { %12 = vsyncpa [#allocation9], 0  ;;  %s20_s23 = sshll.u32 %s2443_s1, 4  ;;  %s1528_s24 = smov [#allocation5]   ;;  %s21_s23 = int_to_ptr.vmem [resolvable:$true] %s20_s23 }
   0x3   :  { %32 = dma.vmem_to_smem %s30_s20, 16, %s1528_s24, [#allocation6]  }
   0x4   :  { %s1529_s25 = smov [#allocation3]   ;;  %s38_s28 = sshll.u32 %s2445_s3, 4  ;;  %s39_s28 = int_to_ptr.vmem [resolvable:$true] %s38_s28 }
   0x5   :  { %23 = dma.vmem_to_smem %s21_s23, 16, %s1529_s25, [#allocation4]  }
   0x6   :  { %s47_s2 = sshll.u32 %s2446_s4, 4  ;;  %s1530_s6 = smov [#allocation7]   ;;  %s48_s2 = int_to_ptr.vmem [resolvable:$true] %s47_s2 }
   0x7   :  { %41 = dma.vmem_to_smem %s39_s28, 16, %s1530_s6, [#allocation6]  }
   0x8   :  { %s1531_s7 = smov [#allocation8]  }
   0x9   :  { %50 = dma.vmem_to_smem %s48_s2, 16, %s1531_s7, [#allocation9]  }
   0xa   :  { %1522 = dma.done.wait [#allocation4], 16  }
   0xb   :  { %1523 = vsyncadd [#allocation4], 4294967280 }
   0xc   :  { %1524 = dma.done.wait [#allocation6], 32  }
   0xd   :  { %1525 = vsyncadd [#allocation6], 4294967264 }
   0xe   :  { %1526 = dma.done.wait [#allocation9], 16  }
   0xf   :  { %1527 = vsyncadd [#allocation9], 4294967280 }
  0x10   :  { %67 = sfence }
  0x11   :  { %v1532_v0 = vmov 0.0   ;;  %v1586_v1 = vld [vmem:[%s2442_s0 + $0x2] ss:$4 sm:$0x3]  ;;  %s1533_s13 = smov 17   ;;  %s1534_s14 = smov 15  }
  0x12   :  { %68 = vst [vmem:[#allocation2] sm:$0x3] %v1532_v0  ;;  %v1591_v2 = vld [vmem:[%s2442_s0 + $0xa] ss:$4 sm:$0x3]  ;;  %s1535_s15 = smov 1  }
  0x13   :  { %69 = vst [vmem:[#allocation2 + $0x8] sm:$0x3] %v1532_v0  ;;  %v1598_v3 = vld [vmem:[%s2442_s0 + $0x3] ss:$4 sm:$0x3]  ;;  %s1536_s16 = smov 127  }
  0x14   :  { %71 = vst [vmem:[#allocation2 + $0xe] sm:$0x3] %v1532_v0  ;;  %v1603_v4 = vld [vmem:[%s2442_s0 + $0xb] ss:$4 sm:$0x3]  ;;  %s1383_s17 = sld [smem:[#allocation3 + $0x1]] }
  0x15   :  { %120 = vst [vmem:[#allocation1] ss:$2 sm:$0xff] %v1586_v1  ;;  %s1537_s18 = smov 113   ;;  %s1386_s19 = sld [smem:[#allocation3 + $0x4]]  ;;  %vm170_vm0 = vcmask 121856   ;;  %vm151_vm1 = vcmask 138240  }
  0x16   :  { %122 = vst [vmem:[#allocation1 + $0x1] ss:$2 sm:$0xff] %v1591_v2  ;;  %s1538_s20 = smov 111   ;;  %s1389_s21 = sld [smem:[#allocation3 + $0x7]]  ;;  %vm189_vm2 = vcmask 7168   ;;  %vm209_vm5 = vcmask 1039360  }
  0x17   :  { %70 = vst [vmem:[#allocation2 + $0x6] sm:$0x3] %v1532_v0  ;;  %s1539_s22 = smov 16   ;;  %s1392_s23 = sld [smem:[#allocation3 + $0x13]]  ;;  %vm247_vm8 = vcmask 908288   ;;  %vm228_vm9 = vcmask 924672  }
  0x18   :  { %s1395_s24 = sld [smem:[#allocation3 + $0x16]]  ;;  %s1540_s25 = smov 112   ;;  %vm274_vm10 = vcmask 130048   ;;  %vm326_vm11 = vcmask 916480   ;;  %vm720_vm12 = vcmask 1040384   ;;  %vm722_vm13 = vcmask 1041409  }
  0x19   :  { %s1398_s26 = sld [smem:[#allocation3 + $0x19]] }
  0x1a   :  { %v261_v28 = vstv %s1383_s17  ;;  %s1385_s27 = sld [smem:[#allocation3 + $0x3]] }
  0x1b   :  { %v292_v34 = vstv %s1386_s19  ;;  %s1394_s28 = sld [smem:[#allocation3 + $0x15]] }
  0x1c   :  { %v313_v39 = vstv %s1389_s21  ;;  %s1674_s29 = sld [smem:[#allocation3 + $0x5]] }
  0x1d   :  { %v123_v5 = vld [vmem:[#allocation1] sm:$0xff]  ;;  %v346_v43 = vstv %s1392_s23  ;;  %s1684_s30 = sld [smem:[#allocation3 + $0x17]] }
  0x1e   :  { %125 = vst [vmem:[#allocation2 + $0x2] sm:$0xf] %v123_v5  ;;  %v376_v48 = vstv %s1395_s24  ;;  %s1696_s2 = sld [smem:[#allocation3 + $0xa]] }
  0x1f   :  { %128 = vst [vmem:[#allocation1] ss:$2 sm:$0xff] %v1598_v3  ;;  %v397_v53 = vstv %s1398_s26  ;;  %s1725_s6 = sld [smem:[#allocation3]] }
  0x20   :  { %130 = vst [vmem:[#allocation1 + $0x1] ss:$2 sm:$0xff] %v1603_v4  ;;  %s1404_s7 = sld [smem:[#allocation3 + $0xd]] }
  0x21   :  { %s1741_s1 = sld [smem:[#allocation5]] }
  0x22   :  { %s1744_s3 = sld [smem:[#allocation3 + $0x2]] }
  0x23   :  { %s1407_s4 = sld [smem:[#allocation3 + $0x10]] }
  0x24   :  { %s1410_s8 = sld [smem:[#allocation3 + $0x1c]] }
  0x25   :  { %v139_v6 = vld [vmem:[#allocation2] sm:$0x3f]  ;;  %s1413_s9 = sld [smem:[#allocation3 + $0x1f]] }
  0x26   :  { %v1607_v8 = vld [vmem:[#allocation2] sm:$0x3f]  ;;  %s1797_s10 = sld [smem:[#allocation3 + $0x6]] }
  0x27   :  { %v131_v7 = vld [vmem:[#allocation1] sm:$0xff]  ;;  %v177_v12 = vld [vmem:[#allocation2] sm:$0x3f]  ;;  %v262_v29 = vmul.f32 %v261_v28, %v1607_v8  ;;  %v347_v44 = vmul.f32 %v346_v43, %v1607_v8  ;;  %s1801_s11 = sld [smem:[#allocation3 + $0x8]] }
  0x28   :  { %134 = vst [vmem:[#allocation2 + $0xa] sm:$0xf] %v131_v7  ;;  %v197_v16 = vld [vmem:[#allocation2 + $0x2] sm:$0x3f]  ;;  %s1416_s12 = sld [smem:[#allocation3 + $0x22]] }
  0x29   :  { %141 = vst [vmem:[#allocation1] ss:$4 sm:$0xff] %v139_v6  ;;  %v216_v20 = vld [vmem:[#allocation2 + $0x2] sm:$0x3f]  ;;  %s1816_s17 = sld [smem:[#allocation3 + $0x18]] }
  0x2a   :  { %v235_v24 = vld [vmem:[#allocation2 + $0x2] sm:$0x3f]  ;;  %s1820_s19 = sld [smem:[#allocation3 + $0x12]] }
  0x2b   :  { %v196_v33 = vld [vmem:[#allocation2 + $0x2] sm:$0xf]  ;;  %v314_v40 = vmul.f32 %v313_v39, %v235_v24  ;;  %v398_v54 = vmul.f32 %v397_v53, %v235_v24  ;;  %s1825_s21 = sld [smem:[#allocation3 + $0x1a]] }
  0x2c   :  { %v293_v35 = vmul.f32 %v292_v34, %v196_v33  ;;  %v377_v49 = vmul.f32 %v376_v48, %v196_v33  ;;  %s1833_s23 = sld [smem:[#allocation5 + $0x1]] }
  0x2d   :  { %s1836_s24 = sld [smem:[#allocation3 + $0x14]] }
  0x2e   :  { %s1877_s26 = sld [smem:[#allocation3 + $0xc]] }
  0x2f   :  { %v422_v57 = vld [vmem:[#allocation2 + $0x8] sm:$0x3f] }
  0x30   :  { %v142_v9 = vld.sshfl [vmem:[#allocation1] sm:$0xff pattern:$0x73625140]  ;;  %v144_v10 = vld.sshfl [vmem:[#allocation1 + $0x10] sm:$0xff pattern:$0x73625140] }
  0x31   :  { %145 = vrot.lane.b32.xlu0 %v142_v9, %s1533_s13  ;;  %149 = vrot.lane.b32.xlu1 %v144_v10, %s1533_s13  ;;  %v143_v11 = vld.sshfl [vmem:[#allocation1 + $0x8] sm:$0xff pattern:$0x73625140]  ;;  %v1649_v62 = vld [vmem:[#allocation2 + $0x8] sm:$0x3f] }
  0x32   :  { %160 = vst [vmem:[#allocation1] ss:$4 sm:$0xff] %v1607_v8  ;;  %v458_v8 = vld [vmem:[#allocation2 + $0x8] sm:$0x3f] }
  0x39   :  { %147 = vrot.lane.b32.xlu0 %v143_v11, %s1533_s13  ;;  %v162_v13 = vld.sshfl [vmem:[#allocation1 + $0x8] sm:$0xff pattern:$0x73625140]  ;;  %v161_v14 = vld.sshfl [vmem:[#allocation1] sm:$0xff pattern:$0x73625140] }
  0x3a   :  { %166 = vrot.lane.b32.xlu2 %v162_v13, %s1534_s14  ;;  %v163_v15 = vld.sshfl [vmem:[#allocation1 + $0x10] sm:$0xff pattern:$0x73625140]  ;;  %164 = vrot.lane.b32.xlu1 %v161_v14, %s1534_s14 }
  0x3b   :  { %179 = vst [vmem:[#allocation1] ss:$4 sm:$0xff] %v177_v12 }
  0x42   :  { %168 = vrot.lane.b32.xlu2 %v163_v15, %s1534_s14  ;;  %v180_v17 = vld.sshfl [vmem:[#allocation1] sm:$0xff pattern:$0x73625140]  ;;  %v181_v18 = vld.sshfl [vmem:[#allocation1 + $0x8] sm:$0xff pattern:$0x73625140]  ;;  %v72_v15 = vlaneseq }
  0x43   :  { %183 = vrot.lane.b32.xlu0 %v180_v17, %s1535_s15  ;;  %v182_v19 = vld.sshfl [vmem:[#allocation1 + $0x10] sm:$0xff pattern:$0x73625140]  ;;  %185 = vrot.lane.b32.xlu1 %v181_v18, %s1535_s15 }
  0x44   :  { %199 = vst [vmem:[#allocation1] ss:$4 sm:$0xff] %v197_v16  ;;  %v477_v17 = vld [vmem:[#allocation2 + $0xa] sm:$0x3f]  ;;  %v73_v18 = vand.u32 127, %v72_v15  ;;  %vm2006_vm14 = vcmp.lt.s32.totalorder %v72_v15, 256 }
  0x46   :  { %v79_v28 = vand.u32 15, %v73_v18 }
  0x48   :  { %vm1677_vm3 = vcmp.ge.s32.totalorder %v79_v28, 1  ;;  %vm1705_vm7 = vcmp.le.s32.totalorder %v79_v28, 14 }
  0x4a   :  { %187 = vrot.lane.b32.xlu2 %v182_v19, %s1535_s15 }
  0x4b   :  { %v200_v21 = vld.sshfl [vmem:[#allocation1] sm:$0xff pattern:$0x73625140]  ;;  %v201_v22 = vld.sshfl [vmem:[#allocation1 + $0x8] sm:$0xff pattern:$0x73625140] }
  0x4c   :  { %203 = vrot.lane.b32.xlu0 %v200_v21, %s1536_s16  ;;  %v202_v23 = vld.sshfl [vmem:[#allocation1 + $0x10] sm:$0xff pattern:$0x73625140]  ;;  %205 = vrot.lane.b32.xlu1 %v201_v22, %s1536_s16 }
  0x4d   :  { %218 = vst [vmem:[#allocation1] ss:$4 sm:$0xff] %v216_v20 }
  0x52   :  { %207 = vrot.lane.b32.xlu2 %v202_v23, %s1536_s16 }
  0x54   :  { %v220_v25 = vld.sshfl [vmem:[#allocation1 + $0x8] sm:$0xff pattern:$0x73625140]  ;;  %v221_v26 = vld.sshfl [vmem:[#allocation1 + $0x10] sm:$0xff pattern:$0x73625140] }
  0x55   :  { %224 = vrot.lane.b32.xlu0 %v220_v25, %s1537_s18  ;;  %v219_v27 = vld.sshfl [vmem:[#allocation1] sm:$0xff pattern:$0x73625140]  ;;  %226 = vrot.lane.b32.xlu1 %v221_v26, %s1537_s18  ;;  %v74_v26 = vadd.s32 128, %v73_v18 }
  0x56   :  { %237 = vst [vmem:[#allocation1] ss:$4 sm:$0xff] %v235_v24 }
  0x5d   :  { %v240_v30 = vld.sshfl [vmem:[#allocation1 + $0x10] sm:$0xff pattern:$0x73625140]  ;;  %v238_v31 = vld.sshfl [vmem:[#allocation1] sm:$0xff pattern:$0x73625140]  ;;  %222 = vrot.lane.b32.xlu1 %v219_v27, %s1537_s18 }
  0x5e   :  { %245 = vrot.lane.b32.xlu0 %v240_v30, %s1538_s20  ;;  %v239_v32 = vld.sshfl [vmem:[#allocation1 + $0x8] sm:$0xff pattern:$0x73625140]  ;;  %v495_v30 = vld [vmem:[#allocation2 + $0xa] sm:$0x3f] }
  0x5f   :  { %264 = vst [vmem:[#allocation1] ss:$4 sm:$0xff] %v262_v29  ;;  %243 = vrot.lane.b32.xlu2 %v239_v32, %s1538_s20  ;;  %v86_v29 = vand.u32 15, %v74_v26 }
  0x61   :  { %vm1686_vm4 = vcmp.ge.s32.totalorder %v86_v29, 1  ;;  %vm1700_vm6 = vcmp.le.s32.totalorder %v86_v29, 14 }
  0x66   :  { %v267_v36 = vld.sshfl [vmem:[#allocation1 + $0x10] sm:$0xff pattern:$0x73625140]  ;;  %v265_v37 = vld.sshfl [vmem:[#allocation1] sm:$0xff pattern:$0x73625140] }
  0x67   :  { %241 = vrot.lane.b32.xlu2 %v238_v31, %s1538_s20  ;;  %272 = vrot.lane.b32.xlu0 %v267_v36, %s1539_s22  ;;  %v266_v38 = vld.sshfl [vmem:[#allocation1 + $0x8] sm:$0xff pattern:$0x73625140] }
  0x68   :  { %295 = vst [vmem:[#allocation1] ss:$4 sm:$0xff] %v293_v35 }
  0x6f   :  { %270 = vrot.lane.b32.xlu2 %v266_v38, %s1539_s22  ;;  %v1631_v41 = vld.sshfl [vmem:[#allocation1] sm:$0xff pattern:$0x73625140]  ;;  %v1633_v42 = vld.sshfl [vmem:[#allocation1 + $0x8] sm:$0xff pattern:$0x73625140] }
  0x70   :  { %316 = vst [vmem:[#allocation1] ss:$4 sm:$0xff] %v314_v40  ;;  %v288_v40 = vstv %s1385_s27  ;;  %s1879_s27 = sld [smem:[#allocation3 + $0x9]] }
  0x77   :  { %268 = vrot.lane.b32.xlu2 %v265_v37, %s1539_s22  ;;  %v319_v45 = vld.sshfl [vmem:[#allocation1 + $0x10] sm:$0xff pattern:$0x73625140]  ;;  %v317_v46 = vld.sshfl [vmem:[#allocation1] sm:$0xff pattern:$0x73625140] }
  0x78   :  { %324 = vrot.lane.b32.xlu1 %v319_v45, %s1540_s25  ;;  %v318_v47 = vld.sshfl [vmem:[#allocation1 + $0x8] sm:$0xff pattern:$0x73625140] }
  0x79   :  { %349 = vst [vmem:[#allocation1] ss:$4 sm:$0xff] %v347_v44  ;;  %322 = vrot.lane.b32.xlu0 %v318_v47, %s1540_s25  ;;  %v372_v44 = vstv %s1394_s28  ;;  %s1884_s28 = sld [smem:[#allocation3 + $0xe]] }
  0x80   :  { %320 = vrot.lane.b32.xlu1 %v317_v46, %s1540_s25  ;;  %v352_v50 = vld.sshfl [vmem:[#allocation1 + $0x10] sm:$0xff pattern:$0x73625140]  ;;  %v350_v51 = vld.sshfl [vmem:[#allocation1] sm:$0xff pattern:$0x73625140] }
  0x81   :  { %357 = vrot.lane.b32.xlu2 %v352_v50, %s1539_s22  ;;  %v351_v52 = vld.sshfl [vmem:[#allocation1 + $0x8] sm:$0xff pattern:$0x73625140] }
  0x82   :  { %379 = vst [vmem:[#allocation1] ss:$4 sm:$0xff] %v377_v49 }
  0x88   :  { %355 = vrot.lane.b32.xlu1 %v351_v52, %s1539_s22 }
  0x89   :  { %v1642_v55 = vld.sshfl [vmem:[#allocation1] sm:$0xff pattern:$0x73625140]  ;;  %v1644_v56 = vld.sshfl [vmem:[#allocation1 + $0x8] sm:$0xff pattern:$0x73625140] }
  0x8a   :  { %400 = vst [vmem:[#allocation1] ss:$4 sm:$0xff] %v398_v54 }
  0x90   :  { %353 = vrot.lane.b32.xlu1 %v350_v51, %s1539_s22  ;;  %v1698_v51 = vld [vmem:[#allocation2 + $0xa] sm:$0x3f] }
  0x91   :  { %v403_v58 = vld.sshfl [vmem:[#allocation1 + $0x10] sm:$0xff pattern:$0x73625140]  ;;  %v401_v59 = vld.sshfl [vmem:[#allocation1] sm:$0xff pattern:$0x73625140] }
  0x92   :  { %408 = vrot.lane.b32.xlu0 %v403_v58, %s1540_s25  ;;  %v402_v60 = vld.sshfl [vmem:[#allocation1 + $0x8] sm:$0xff pattern:$0x73625140] }
  0x93   :  { %424 = vst [vmem:[#allocation1] ss:$4 sm:$0xff] %v422_v57  ;;  %406 = vrot.lane.b32.xlu2 %v402_v60, %s1540_s25  ;;  %v303_v60 = vstv %s1674_s29  ;;  %s1887_s29 = sld [smem:[#allocation3 + $0xb]] }
  0x94   :  { %v167_v61 = vpop.permute.xlu2 %166 }
  0x9a   :  { %v426_v63 = vld.sshfl [vmem:[#allocation1 + $0x8] sm:$0xff pattern:$0x73625140]  ;;  %v427_v0 = vld.sshfl [vmem:[#allocation1 + $0x10] sm:$0xff pattern:$0x73625140] }
  0x9b   :  { %404 = vrot.lane.b32.xlu2 %v401_v59, %s1540_s25  ;;  %430 = vrot.lane.b32.xlu1 %v426_v63, %s1533_s13  ;;  %v425_v5 = vld.sshfl [vmem:[#allocation1] sm:$0xff pattern:$0x73625140] }
  0x9c   :  { %428 = vrot.lane.b32.xlu0 %v425_v5, %s1533_s13  ;;  %442 = vst [vmem:[#allocation1] ss:$4 sm:$0xff] %v1649_v62  ;;  %v169_v6 = vpop.permute.xlu2 %168 }
  0x9d   :  { %v1656_v7 = vsel %vm170_vm0, %v167_v61, %v169_v6 }
  0xa3   :  { %v146_v9 = vpop.permute.xlu0 %145  ;;  %v150_v10 = vpop.permute.xlu1 %149  ;;  %v445_v11 = vld.sshfl [vmem:[#allocation1 + $0x10] sm:$0xff pattern:$0x73625140]  ;;  %v443_v12 = vld.sshfl [vmem:[#allocation1] sm:$0xff pattern:$0x73625140]  ;;  %432 = vrot.lane.b32.xlu2 %v427_v0, %s1533_s13 }
  0xa4   :  { %450 = vrot.lane.b32.xlu0 %v445_v11, %s1534_s14  ;;  %v444_v13 = vld.sshfl [vmem:[#allocation1 + $0x8] sm:$0xff pattern:$0x73625140]  ;;  %v188_v14 = vpop.permute.xlu2 %187 }
  0xa5   :  { %460 = vst [vmem:[#allocation1] ss:$4 sm:$0xff] %v458_v8 }
  0xab   :  { %v148_v16 = vpop.permute.xlu0 %147  ;;  %448 = vrot.lane.b32.xlu2 %v444_v13, %s1534_s14 }
  0xac   :  { %v1662_v19 = vsel %vm151_vm1, %v146_v9, %v148_v16  ;;  %v1665_v20 = vsel %vm151_vm1, %v148_v16, %v150_v10  ;;  %446 = vrot.lane.b32.xlu0 %v443_v12, %s1534_s14  ;;  %v463_v21 = vld.sshfl [vmem:[#allocation1 + $0x10] sm:$0xff pattern:$0x73625140]  ;;  %v461_v22 = vld.sshfl [vmem:[#allocation1] sm:$0xff pattern:$0x73625140]  ;;  %v165_v23 = vpop.permute.xlu1 %164  ;;  %v208_v27 = vpop.permute.xlu2 %207  ;;  %v538_v16 = vstv %s1696_s2 }
  0xad   :  { %468 = vrot.lane.b32.xlu1 %v463_v21, %s1535_s15  ;;  %v462_v24 = vld.sshfl [vmem:[#allocation1 + $0x8] sm:$0xff pattern:$0x73625140]  ;;  %v1671_v25 = vsel %vm170_vm0, %v165_v23, %v167_v61  ;;  %v387_v61 = vstv %s1684_s30  ;;  %v539_v23 = vmul.f32 %v538_v16, %v1649_v62  ;;  %s1920_s30 = sld [smem:[#allocation3 + $0xf]] }
  0xae   :  { %479 = vst [vmem:[#allocation1] ss:$4 sm:$0xff] %v477_v17  ;;  %s1929_s2 = sld [smem:[#allocation3 + $0x11]] }
  0xb4   :  { %466 = vrot.lane.b32.xlu0 %v462_v24, %s1535_s15 }
  0xb5   :  { %464 = vrot.lane.b32.xlu1 %v461_v22, %s1535_s15  ;;  %v481_v31 = vld.sshfl [vmem:[#allocation1 + $0x8] sm:$0xff pattern:$0x73625140]  ;;  %v482_v32 = vld.sshfl [vmem:[#allocation1 + $0x10] sm:$0xff pattern:$0x73625140]  ;;  %v184_v33 = vpop.permute.xlu0 %183  ;;  %v186_v34 = vpop.permute.xlu1 %185 }
  0xb6   :  { %v480_v36 = vld.sshfl [vmem:[#allocation1] sm:$0xff pattern:$0x73625140]  ;;  %487 = vrot.lane.b32.xlu2 %v482_v32, %s1536_s16  ;;  %v190_v37 = vsel %vm189_vm2, %v184_v33, %v186_v34  ;;  %v191_v38 = vsel %vm189_vm2, %v186_v34, %v188_v14  ;;  %v255_v32 = vstv %s1725_s6  ;;  %v1754_v33 = vsel %vm1677_vm3, %v1662_v19, 0.0  ;;  %v476_v34 = vld [vmem:[#allocation2 + $0xa] sm:$0xf] }
  0xb7   :  { %497 = vst [vmem:[#allocation1] ss:$4 sm:$0xff] %v495_v30  ;;  %v194_v43 = vsel %vm1677_vm3, %v190_v37, 0.0  ;;  %v195_v45 = vsel %vm1686_vm4, %v191_v38, 0.0  ;;  %v256_v37 = vmul.f32 %v255_v32, %v1754_v33  ;;  %s1932_s6 = sld [smem:[#allocation3 + $0x1e]] }
  0xb8   :  { %v289_v47 = vmul.f32 %v288_v40, %v194_v43  ;;  %v290_v48 = vmul.f32 %v288_v40, %v195_v45  ;;  %v373_v49 = vmul.f32 %v372_v44, %v194_v43  ;;  %v374_v50 = vmul.f32 %v372_v44, %v195_v45 }
  0xb9   :  { %v1694_v46 = vpop.permute.xlu2 %243  ;;  %v136_v40 = vstv %s1741_s1  ;;  %v1761_v43 = vsel %vm1705_vm7, %v1671_v25, 0.0  ;;  %v282_v45 = vstv %s1744_s3  ;;  %s1961_s1 = sld [smem:[#allocation3 + $0x20]] }
  0xba   :  { %v300_v59 = vadd.f32 %v1631_v41, %v289_v47  ;;  %v301_v5 = vadd.f32 %v1633_v42, %v290_v48  ;;  %v384_v6 = vadd.f32 %v1642_v55, %v373_v49  ;;  %v385_v10 = vadd.f32 %v1644_v56, %v374_v50  ;;  %s1970_s3 = sld [smem:[#allocation3 + $0x1d]] }
  0xbd   :  { %485 = vrot.lane.b32.xlu1 %v481_v31, %s1536_s16 }
  0xbe   :  { %v500_v54 = vld.sshfl [vmem:[#allocation1 + $0x10] sm:$0xff pattern:$0x73625140]  ;;  %v498_v57 = vld.sshfl [vmem:[#allocation1] sm:$0xff pattern:$0x73625140]  ;;  %v204_v58 = vpop.permute.xlu0 %203  ;;  %v206_v63 = vpop.permute.xlu1 %205 }
  0xbf   :  { %505 = vrot.lane.b32.xlu0 %v500_v54, %s1537_s18  ;;  %v499_v0 = vld.sshfl [vmem:[#allocation1 + $0x8] sm:$0xff pattern:$0x73625140]  ;;  %v210_v8 = vsel %vm209_vm5, %v204_v58, %v206_v63  ;;  %v211_v9 = vsel %vm209_vm5, %v206_v63, %v208_v27  ;;  %v1775_v58 = vsel %vm1686_vm4, %v1665_v20, 0.0  ;;  %v1787_v20 = vsel %vm1700_vm6, %v1656_v7, 0.0 }
  0xc0   :  { %515 = vst [vmem:[#allocation1] ss:$4 sm:$0xff] %v1698_v51  ;;  %503 = vrot.lane.b32.xlu2 %v499_v0, %s1537_s18  ;;  %v214_v41 = vsel %vm1705_vm7, %v210_v8, 0.0  ;;  %v215_v11 = vsel %vm1700_vm6, %v211_v9, 0.0  ;;  %v257_v0 = vmul.f32 %v255_v32, %v1775_v58 }
  0xc1   :  { %v242_v12 = vpop.permute.xlu2 %241  ;;  %v304_v42 = vmul.f32 %v303_v60, %v214_v41  ;;  %v305_v13 = vmul.f32 %v303_v60, %v215_v11  ;;  %v388_v55 = vmul.f32 %v387_v61, %v214_v41  ;;  %v389_v14 = vmul.f32 %v387_v61, %v215_v11 }
  0xc2   :  { %v1729_v17 = vsel %vm247_vm8, %v242_v12, %v1694_v46  ;;  %v593_v60 = vstv %s1407_s4  ;;  %v283_v61 = vmul.f32 %v282_v45, %v1761_v43  ;;  %v259_v9 = vadd.f32 %v257_v0, %v136_v40  ;;  %s1989_s4 = sld [smem:[#allocation3 + $0x21]] }
  0xc3   :  { %v1731_v56 = vadd.f32 %v304_v42, %v300_v59  ;;  %v1733_v18 = vadd.f32 %v305_v13, %v301_v5  ;;  %v1735_v21 = vadd.f32 %v388_v55, %v384_v6  ;;  %v1737_v22 = vadd.f32 %v389_v14, %v385_v10 }
  0xc4   :  { %v594_v5 = vmul.f32 %v593_v60, %v1698_v51  ;;  %v284_v11 = vmul.f32 %v282_v45, %v1787_v20  ;;  %v625_v42 = vstv %s1410_s8  ;;  %v340_v60 = vstv %s1820_s19  ;;  %s1437_s8 = sld [smem:[#allocation7 + $0x19]] }
  0xc5   :  { %483 = vrot.lane.b32.xlu1 %v480_v36, %s1536_s16  ;;  %v570_v36 = vstv %s1404_s7  ;;  %v626_v7 = vmul.f32 %v625_v42, %v1649_v62  ;;  %s1940_s7 = sld [smem:[#allocation3 + $0x1b]] }
  0xc6   :  { %v571_v38 = vmul.f32 %v570_v36, %v476_v34  ;;  %s1449_s19 = sld [smem:[#allocation7 + $0x1c]] }
  0xc7   :  { %501 = vrot.lane.b32.xlu0 %v498_v57, %s1537_s18  ;;  %v518_v24 = vld.sshfl [vmem:[#allocation1 + $0x10] sm:$0xff pattern:$0x73625140]  ;;  %v516_v26 = vld.sshfl [vmem:[#allocation1] sm:$0xff pattern:$0x73625140]  ;;  %v225_v27 = vpop.permute.xlu0 %224  ;;  %v227_v28 = vpop.permute.xlu1 %226  ;;  %v258_v57 = vadd.f32 %v256_v37, %v136_v40 }
  0xc8   :  { %v517_v29 = vld.sshfl [vmem:[#allocation1 + $0x8] sm:$0xff pattern:$0x73625140]  ;;  %v1747_v30 = vsel %vm228_vm9, %v225_v27, %v227_v28  ;;  %v334_v28 = vstv %s1801_s11  ;;  %s879_s11 = sld [smem:[#allocation7]] }
  0xc9   :  { %541 = vst [vmem:[#allocation1] ss:$4 sm:$0xff] %v539_v23  ;;  %v271_v31 = vpop.permute.xlu2 %270  ;;  %521 = vrot.lane.b32.xlu2 %v517_v29, %s1538_s20  ;;  %v1809_v62 = vsel %vm1686_vm4, %v1747_v30, 0.0 }
  0xcf   :  { %523 = vrot.lane.b32.xlu0 %v518_v24, %s1538_s20  ;;  %v223_v44 = vpop.permute.xlu1 %222  ;;  %v657_v24 = vstv %s1413_s9  ;;  %s2116_s9 = sld [smem:[#allocation7 + $0x5]] }
  0xd0   :  { %v543_v47 = vld.sshfl [vmem:[#allocation1 + $0x8] sm:$0xff pattern:$0x73625140]  ;;  %v544_v19 = vld.sshfl [vmem:[#allocation1 + $0x10] sm:$0xff pattern:$0x73625140]  ;;  %v246_v48 = vpop.permute.xlu0 %245  ;;  %v1766_v49 = vsel %vm228_vm9, %v223_v44, %v225_v27  ;;  %v658_v27 = vmul.f32 %v657_v24, %v476_v34  ;;  %v680_v44 = vstv %s1416_s12 }
  0xd1   :  { %547 = vrot.lane.b32.xlu1 %v543_v47, %s1539_s22  ;;  %v542_v50 = vld.sshfl [vmem:[#allocation1] sm:$0xff pattern:$0x73625140]  ;;  %v249_v54 = vsel %vm247_vm8, %v1694_v46, %v246_v48  ;;  %v269_v25 = vpop.permute.xlu2 %268  ;;  %549 = vrot.lane.b32.xlu2 %v544_v19, %s1539_s22  ;;  %v233_v19 = vsel %vm1677_vm3, %v1766_v49, 0.0  ;;  %s1446_s12 = sld [smem:[#allocation7 + $0x10]] }
  0xd2   :  { %573 = vst [vmem:[#allocation1] ss:$4 sm:$0xff] %v571_v38  ;;  %v275_v59 = vsel %vm274_vm10, %v269_v25, %v271_v31  ;;  %v1814_v29 = vsel %vm1700_vm6, %v249_v54, 0.0  ;;  %v252_v54 = vsel %vm1705_vm7, %v1729_v17, 0.0 }
  0xd3   :  { %v279_v63 = vadd.f32 %v275_v59, %v258_v57  ;;  %v336_v30 = vmul.f32 %v334_v28, %v1814_v29  ;;  %v393_v57 = vstv %s1816_s17  ;;  %v335_v0 = vmul.f32 %v334_v28, %v252_v54  ;;  %s2172_s17 = sld [smem:[#allocation7 + $0x2]] }
  0xd5   :  { %v1780_v46 = vadd.f32 %v283_v61, %v279_v63  ;;  %v417_v63 = vstv %s1825_s21  ;;  %s1452_s21 = sld [smem:[#allocation7 + $0x1f]] }
  0xd7   :  { %519 = vrot.lane.b32.xlu0 %v516_v26, %s1538_s20  ;;  %v309_v26 = vstv %s1797_s10  ;;  %s1417_s10 = sld [smem:[#allocation3 + $0x23]] }
  0xd8   :  { %v310_v25 = vmul.f32 %v309_v26, %v233_v19 }
  0xd9   :  { %v1789_v6 = vld.sshfl [vmem:[#allocation1] sm:$0xff pattern:$0x73625140]  ;;  %v1791_v8 = vld.sshfl [vmem:[#allocation1 + $0x8] sm:$0xff pattern:$0x73625140]  ;;  %v273_v10 = vpop.permute.xlu0 %272 }
  0xda   :  { %596 = vst [vmem:[#allocation1] ss:$4 sm:$0xff] %v594_v5  ;;  %v276_v41 = vsel %vm274_vm10, %v271_v31, %v273_v10  ;;  %v311_v31 = vmul.f32 %v309_v26, %v1809_v62  ;;  %v342_v10 = vmul.f32 %v340_v60, %v1775_v58 }
  0xdb   :  { %v280_v12 = vadd.f32 %v276_v41, %v259_v9  ;;  %v358_v23 = vpop.permute.xlu2 %357  ;;  %v394_v9 = vmul.f32 %v393_v57, %v233_v19  ;;  %v419_v19 = vmul.f32 %v417_v63, %v1814_v29 }
  0xdd   :  { %v1795_v13 = vadd.f32 %v284_v11, %v280_v12  ;;  %v418_v12 = vmul.f32 %v417_v63, %v252_v54 }
  0xdf   :  { %545 = vrot.lane.b32.xlu0 %v542_v50, %s1539_s22  ;;  %v681_v50 = vmul.f32 %v680_v44, %v1698_v51 }
  0xe1   :  { %v598_v55 = vld.sshfl [vmem:[#allocation1 + $0x8] sm:$0xff pattern:$0x73625140]  ;;  %v599_v14 = vld.sshfl [vmem:[#allocation1 + $0x10] sm:$0xff pattern:$0x73625140] }
  0xe2   :  { %602 = vrot.lane.b32.xlu1 %v598_v55, %s1540_s25  ;;  %v597_v16 = vld.sshfl [vmem:[#allocation1] sm:$0xff pattern:$0x73625140]  ;;  %604 = vrot.lane.b32.xlu2 %v599_v14, %s1540_s25  ;;  %v366_v55 = vstv %s1836_s24  ;;  %s2218_s24 = sld [smem:[#allocation7 + $0x8]] }
  0xe3   :  { %628 = vst [vmem:[#allocation1] ss:$4 sm:$0xff] %v626_v7  ;;  %v138_v7 = vstv %s1833_s23  ;;  %s1427_s23 = sld [smem:[#allocation7 + $0x6]] }
  0xea   :  { %600 = vrot.lane.b32.xlu1 %v597_v16, %s1540_s25  ;;  %v630_v32 = vld.sshfl [vmem:[#allocation1 + $0x8] sm:$0xff pattern:$0x73625140]  ;;  %v629_v36 = vld.sshfl [vmem:[#allocation1] sm:$0xff pattern:$0x73625140]  ;;  %v325_v37 = vpop.permute.xlu1 %324  ;;  %v344_v16 = vadd.f32 %v342_v10, %v138_v7 }
  0xeb   :  { %634 = vrot.lane.b32.xlu0 %v630_v32, %s1539_s22  ;;  %v631_v34 = vld.sshfl [vmem:[#allocation1 + $0x10] sm:$0xff pattern:$0x73625140]  ;;  %v323_v38 = vpop.permute.xlu0 %322  ;;  %632 = vrot.lane.b32.xlu2 %v629_v36, %s1539_s22  ;;  %v341_v36 = vmul.f32 %v340_v60, %v1754_v33 }
  0xec   :  { %660 = vst [vmem:[#allocation1] ss:$4 sm:$0xff] %v658_v27  ;;  %v328_v40 = vsel %vm326_vm11, %v323_v38, %v325_v37 }
  0xed   :  { %v407_v45 = vpop.permute.xlu2 %406  ;;  %v332_v47 = vadd.f32 %v328_v40, %v311_v31  ;;  %v368_v31 = vmul.f32 %v366_v55, %v1787_v20  ;;  %v395_v20 = vmul.f32 %v393_v57, %v1809_v62 }
  0xef   :  { %v1831_v48 = vadd.f32 %v336_v30, %v332_v47  ;;  %v343_v30 = vadd.f32 %v341_v36, %v138_v7  ;;  %v564_v7 = vstv %s1877_s26  ;;  %s2225_s26 = sld [smem:[#allocation7 + $0x12]] }
  0xf2   :  { %636 = vrot.lane.b32.xlu1 %v631_v34, %s1539_s22  ;;  %v321_v59 = vpop.permute.xlu1 %320 }
  0xf3   :  { %v1844_v49 = vld.sshfl [vmem:[#allocation1] sm:$0xff pattern:$0x73625140]  ;;  %v1846_v61 = vld.sshfl [vmem:[#allocation1 + $0x8] sm:$0xff pattern:$0x73625140]  ;;  %v327_v51 = vsel %vm326_vm11, %v321_v59, %v323_v38 }
  0xf4   :  { %683 = vst [vmem:[#allocation1] ss:$4 sm:$0xff] %v681_v50  ;;  %v331_v5 = vadd.f32 %v327_v51, %v310_v25 }
  0xf5   :  { %v405_v17 = vpop.permute.xlu2 %404 }
  0xf6   :  { %v1851_v41 = vadd.f32 %v335_v0, %v331_v5  ;;  %v410_v11 = vsel %vm326_vm11, %v405_v17, %v407_v45 }
  0xf7   :  { %v414_v42 = vadd.f32 %v410_v11, %v394_v9 }
  0xf9   :  { %v1856_v14 = vadd.f32 %v418_v12, %v414_v42 }
  0xfa   :  { %v356_v24 = vpop.permute.xlu1 %355 }
  0xfb   :  { %v686_v26 = vld.sshfl [vmem:[#allocation1 + $0x10] sm:$0xff pattern:$0x73625140]  ;;  %v685_v27 = vld.sshfl [vmem:[#allocation1 + $0x8] sm:$0xff pattern:$0x73625140]  ;;  %v360_v28 = vsel %vm274_vm10, %v356_v24, %v358_v23  ;;  %v367_v23 = vmul.f32 %v366_v55, %v1761_v43 }
  0xfc   :  { %691 = vrot.lane.b32.xlu1 %v686_v26, %s1540_s25  ;;  %689 = vrot.lane.b32.xlu0 %v685_v27, %s1540_s25  ;;  %v364_v58 = vadd.f32 %v360_v28, %v344_v16  ;;  %v684_v32 = vld.sshfl [vmem:[#allocation1] sm:$0xff pattern:$0x73625140]  ;;  %v532_v16 = vstv %s1879_s27  ;;  %s2227_s27 = sld [smem:[#allocation7 + $0x22]] }
  0xfd   :  { %687 = vrot.lane.b32.xlu2 %v684_v32, %s1540_s25  ;;  %v433_v59 = vpop.permute.xlu2 %432 }
  0xfe   :  { %v1864_v37 = vadd.f32 %v368_v31, %v364_v58  ;;  %v581_v58 = vstv %s1884_s28  ;;  %s2237_s28 = sld [smem:[#allocation8 + $0x1]] }
 0x102   :  { %v354_v34 = vpop.permute.xlu1 %353 }
 0x103   :  { %v359_v38 = vsel %vm274_vm10, %v354_v34, %v356_v24 }
 0x104   :  { %v363_v40 = vadd.f32 %v359_v38, %v343_v30  ;;  %v409_v44 = vpop.permute.xlu0 %408  ;;  %v558_v38 = vstv %s1887_s29  ;;  %s2239_s29 = sld [smem:[#allocation7 + $0x14]] }
 0x105   :  { %v411_v47 = vsel %vm326_vm11, %v407_v45, %v409_v44  ;;  %v449_v0 = vpop.permute.xlu2 %448 }
 0x106   :  { %v1871_v50 = vadd.f32 %v367_v23, %v363_v40  ;;  %v415_v54 = vadd.f32 %v411_v47, %v395_v20 }
 0x108   :  { %v1873_v33 = vadd.f32 %v419_v19, %v415_v54 }
 0x10d   :  { %v431_v51 = vpop.permute.xlu1 %430 }
 0x10e   :  { %v429_v25 = vpop.permute.xlu0 %428  ;;  %v435_v11 = vsel %vm151_vm1, %v431_v51, %v433_v59 }
 0x10f   :  { %v1897_v24 = vsel %vm1686_vm4, %v435_v11, 0.0 }
 0x110   :  { %v488_v9 = vpop.permute.xlu2 %487  ;;  %v534_v28 = vmul.f32 %v532_v16, %v1897_v24 }
 0x112   :  { %v536_v40 = vadd.f32 %v534_v28, %v1795_v13 }
 0x116   :  { %v451_v60 = vpop.permute.xlu0 %450 }
 0x117   :  { %v453_v31 = vsel %vm170_vm0, %v449_v0, %v451_v60  ;;  %v434_v60 = vsel %vm151_vm1, %v429_v25, %v431_v51 }
 0x118   :  { %v1912_v23 = vsel %vm1700_vm6, %v453_v31, 0.0 }
 0x119   :  { %v560_v19 = vmul.f32 %v558_v38, %v1912_v23 }
 0x11a   :  { %v1875_v17 = vpop.permute.xlu2 %503 }
 0x11e   :  { %v447_v5 = vpop.permute.xlu0 %446 }
 0x11f   :  { %v469_v43 = vpop.permute.xlu1 %468  ;;  %v452_v51 = vsel %vm170_vm0, %v447_v5, %v449_v0 }
 0x123   :  { %v1882_v63 = vpop.permute.xlu2 %521 }
 0x126   :  { %v467_v62 = vpop.permute.xlu0 %466 }
 0x127   :  { %v465_v57 = vpop.permute.xlu1 %464  ;;  %v471_v29 = vsel %vm189_vm2, %v467_v62, %v469_v43 }
 0x128   :  { %v1892_v55 = vsel %vm1686_vm4, %v471_v29, 0.0  ;;  %v470_v54 = vsel %vm189_vm2, %v465_v57, %v467_v62 }
 0x129   :  { %v566_v26 = vmul.f32 %v564_v7, %v1892_v55  ;;  %v474_v13 = vsel %vm1677_vm3, %v470_v54, 0.0 }
 0x12b   :  { %v568_v36 = vadd.f32 %v566_v26, %v1733_v18  ;;  %v550_v34 = vpop.permute.xlu2 %549  ;;  %v438_v26 = vsel %vm1677_vm3, %v434_v60, 0.0 }
 0x12c   :  { %v533_v25 = vmul.f32 %v532_v16, %v438_v26 }
 0x12d   :  { %v579_v18 = vadd.f32 %v1791_v8, %v568_v36  ;;  %v565_v8 = vmul.f32 %v564_v7, %v474_v13 }
 0x12e   :  { %v535_v16 = vadd.f32 %v533_v25, %v1780_v46 }
 0x12f   :  { %v486_v45 = vpop.permute.xlu1 %485  ;;  %v567_v7 = vadd.f32 %v565_v8, %v1731_v56 }
 0x130   :  { %v490_v27 = vsel %vm209_vm5, %v486_v45, %v488_v9 }
 0x131   :  { %v506_v10 = vpop.permute.xlu0 %505  ;;  %v1906_v32 = vsel %vm1700_vm6, %v490_v27, 0.0  ;;  %v587_v27 = vstv %s1920_s30  ;;  %s1438_s30 = sld [smem:[#allocation7 + $0x1a]] }
 0x132   :  { %v583_v20 = vmul.f32 %v581_v58, %v1906_v32  ;;  %v508_v62 = vsel %vm228_vm9, %v1875_v17, %v506_v10 }
 0x133   :  { %v1938_v28 = vsel %vm1686_vm4, %v508_v62, 0.0 }
 0x134   :  { %v585_v43 = vadd.f32 %v583_v20, %v579_v18  ;;  %v613_v20 = vstv %s1929_s2  ;;  %s2293_s2 = sld [smem:[#allocation7 + $0x1b]] }
 0x137   :  { %v484_v12 = vpop.permute.xlu1 %483 }
 0x138   :  { %v489_v57 = vsel %vm209_vm5, %v484_v12, %v486_v45  ;;  %v456_v45 = vsel %vm1705_vm7, %v452_v51, 0.0  ;;  %v589_v12 = vmul.f32 %v587_v27, %v1938_v28 }
 0x139   :  { %v502_v42 = vpop.permute.xlu0 %501  ;;  %v493_v10 = vsel %vm1705_vm7, %v489_v57, 0.0 }
 0x13a   :  { %v582_v5 = vmul.f32 %v581_v58, %v493_v10  ;;  %v651_v58 = vstv %s1932_s6  ;;  %v591_v46 = vadd.f32 %v589_v12, %v1831_v48  ;;  %v668_v12 = vstv %s1961_s1  ;;  %s1428_s1 = sld [smem:[#allocation7 + $0x7]] }
 0x13b   :  { %v652_v60 = vmul.f32 %v651_v58, %v474_v13  ;;  %s1442_s6 = sld [smem:[#allocation7 + $0xc]] }
 0x13c   :  { %v605_v36 = vpop.permute.xlu2 %604 }
 0x13d   :  { %v654_v25 = vadd.f32 %v652_v60, %v1735_v21 }
 0x141   :  { %v524_v30 = vpop.permute.xlu0 %523 }
 0x142   :  { %v526_v0 = vsel %vm247_vm8, %v1882_v63, %v524_v30 }
 0x143   :  { %v548_v44 = vpop.permute.xlu1 %547 }
 0x144   :  { %v552_v47 = vsel %vm274_vm10, %v548_v44, %v550_v34  ;;  %v507_v34 = vsel %vm228_vm9, %v502_v42, %v1875_v17 }
 0x145   :  { %v556_v59 = vadd.f32 %v552_v47, %v536_v40  ;;  %v559_v40 = vmul.f32 %v558_v38, %v456_v45  ;;  %v578_v47 = vadd.f32 %v1789_v6, %v567_v7  ;;  %v1966_v17 = vsel %vm1677_vm3, %v507_v34, 0.0  ;;  %v633_v7 = vpop.permute.xlu2 %632 }
 0x146   :  { %v619_v38 = vstv %s1940_s7  ;;  %v588_v48 = vmul.f32 %v587_v27, %v1966_v17  ;;  %v653_v27 = vmul.f32 %v651_v58, %v1892_v55  ;;  %s1425_s7 = sld [smem:[#allocation7 + $0x4]] }
 0x147   :  { %v562_v9 = vadd.f32 %v560_v19, %v556_v59  ;;  %v1958_v19 = vsel %vm1700_vm6, %v526_v0, 0.0  ;;  %v584_v18 = vadd.f32 %v582_v5, %v578_v47  ;;  %v620_v8 = vmul.f32 %v619_v38, %v438_v26 }
 0x148   :  { %v590_v13 = vadd.f32 %v588_v48, %v1851_v41  ;;  %v669_v5 = vmul.f32 %v668_v12, %v493_v10  ;;  %v665_v41 = vadd.f32 %v1844_v49, %v654_v25  ;;  %v621_v55 = vmul.f32 %v619_v38, %v1897_v24  ;;  %v103_v49 = vld [vmem:[%s2442_s0] ss:$4 sm:$0x3] }
 0x149   :  { %v706_v29 = vadd.f32 %v585_v43, %v562_v9  ;;  %v520_v11 = vpop.permute.xlu0 %519 }
 0x14a   :  { %v525_v9 = vsel %vm247_vm8, %v520_v11, %v1882_v63  ;;  %v622_v11 = vadd.f32 %v620_v8, %v1871_v50  ;;  %v671_v47 = vadd.f32 %v669_v5, %v665_v41  ;;  %v623_v24 = vadd.f32 %v621_v55, %v1864_v37 }
 0x14b   :  { %v1979_v51 = vsel %vm1705_vm7, %v525_v9, 0.0 }
 0x14c   :  { %v614_v21 = vmul.f32 %v613_v20, %v1979_v51 }
 0x151   :  { %v546_v31 = vpop.permute.xlu0 %545 }
 0x152   :  { %v551_v56 = vsel %vm274_vm10, %v546_v31, %v548_v44  ;;  %v615_v44 = vmul.f32 %v613_v20, %v1958_v19 }
 0x153   :  { %v555_v30 = vadd.f32 %v551_v56, %v535_v16 }
 0x154   :  { %v603_v54 = vpop.permute.xlu1 %602 }
 0x155   :  { %v561_v42 = vadd.f32 %v559_v40, %v555_v30  ;;  %v607_v6 = vsel %vm326_vm11, %v603_v54, %v605_v36  ;;  %v655_v40 = vadd.f32 %v653_v27, %v1737_v22 }
 0x156   :  { %v611_v59 = vadd.f32 %v607_v6, %v591_v46 }
 0x157   :  { %v705_v43 = vadd.f32 %v584_v18, %v561_v42  ;;  %v666_v18 = vadd.f32 %v1846_v61, %v655_v40  ;;  %v688_v8 = vpop.permute.xlu2 %687 }
 0x158   :  { %v617_v62 = vadd.f32 %v615_v44, %v611_v59 }
 0x15a   :  { %v708_v57 = vadd.f32 %v706_v29, %v617_v62  ;;  %v645_v29 = vstv %s1970_s3  ;;  %s1431_s3 = sld [smem:[#allocation7 + $0x13]] }
 0x15b   :  { %v646_v36 = vmul.f32 %v645_v29, %v456_v45  ;;  %v670_v45 = vmul.f32 %v668_v12, %v1906_v32  ;;  %v647_v22 = vmul.f32 %v645_v29, %v1912_v23  ;;  %v1375_v32 = vld [vmem:[%s2442_s0 + $0x8] ss:$4 sm:$0x3]  ;;  %v674_v23 = vstv %s1989_s4  ;;  %s1434_s4 = sld [smem:[#allocation7 + $0x16]] }
 0x15c   :  { %v601_v0 = vpop.permute.xlu1 %600  ;;  %v710_v10 = vmax.f32 %v708_v57, 0.0  ;;  %v676_v15 = vmul.f32 %v674_v23, %v1938_v28  ;;  %v675_v9 = vmul.f32 %v674_v23, %v1966_v17  ;;  %v700_v57 = vstv %s1417_s10  ;;  %s2128_s10 = sld [smem:[#allocation7 + $0xa]] }
 0x15d   :  { %v606_v16 = vsel %vm326_vm11, %v601_v0, %v603_v54  ;;  %v635_v63 = vpop.permute.xlu0 %634  ;;  %v672_v60 = vadd.f32 %v670_v45, %v666_v18  ;;  %v702_v0 = vmul.f32 %v700_v57, %v1958_v19  ;;  %v701_v27 = vmul.f32 %v700_v57, %v1979_v51 }
 0x15e   :  { %v610_v26 = vadd.f32 %v606_v16, %v590_v13  ;;  %v638_v31 = vsel %vm274_vm10, %v633_v7, %v635_v63  ;;  %v719_v58 = vrot.slane %v710_v10, 7  ;;  %v678_v7 = vadd.f32 %v676_v15, %v1873_v33 }
 0x15f   :  { %v642_v34 = vadd.f32 %v638_v31, %v622_v11  ;;  %v677_v13 = vadd.f32 %v675_v9, %v1856_v14  ;;  %v1376_v14 = vld [vmem:[%s2442_s0 + $0x1] ss:$4 sm:$0x3] }
 0x160   :  { %v616_v56 = vadd.f32 %v614_v21, %v610_v26 }
 0x161   :  { %v648_v50 = vadd.f32 %v646_v36, %v642_v34  ;;  %v1377_v34 = vld [vmem:[%s2442_s0 + $0x9] ss:$4 sm:$0x3]  ;;  %s1422_s0 = sld [smem:[#allocation7 + $0x1]] }
 0x162   :  { %v707_v30 = vadd.f32 %v705_v43, %v616_v56 }
 0x163   :  { %v711_v20 = vadd.f32 %v671_v47, %v648_v50 }
 0x164   :  { %v709_v46 = vmax.f32 %v707_v30, 0.0  ;;  %v637_v54 = vpop.permute.xlu1 %636 }
 0x165   :  { %v639_v42 = vsel %vm274_vm10, %v635_v63, %v637_v54 }
 0x166   :  { %v721_v38 = vsel %vm720_vm12, %v709_v46, %v719_v58  ;;  %v723_v37 = vsel %vm722_vm13, %v709_v46, %v719_v58  ;;  %v643_v44 = vadd.f32 %v639_v42, %v623_v24 }
 0x167   :  { %v724_v59 = vrot.slane %v723_v37, 1  ;;  %v727_v61 = vadd.f32 %v721_v38, %v103_v49 }
 0x168   :  { %v649_v43 = vadd.f32 %v647_v22, %v643_v44 }
 0x169   :  { %v728_v48 = vadd.f32 %v1375_v32, %v724_v59  ;;  %743 = vst.msk [vmem:[%s2447_s5] ss:$4 sm:$0x3] %vm2006_vm14, %v727_v61 }
 0x16a   :  { %752 = vst [vmem:[#allocation1] ss:$2 sm:$0xff] %v727_v61  ;;  %v712_v62 = vadd.f32 %v672_v60, %v649_v43  ;;  %v886_v60 = vstv %s1422_s0  ;;  %s2328_s0 = sld [smem:[#allocation7 + $0xe]] }
 0x16b   :  { %1418 = vst.msk [vmem:[%s2447_s5 + $0x8] ss:$4 sm:$0x3] %vm2006_vm14, %v728_v48 }
 0x16c   :  { %754 = vst [vmem:[#allocation1 + $0x1] ss:$2 sm:$0xff] %v728_v48 }
 0x16e   :  { %v692_v25 = vpop.permute.xlu1 %691  ;;  %v690_v12 = vpop.permute.xlu0 %689 }
 0x16f   :  { %v694_v28 = vsel %vm326_vm11, %v690_v12, %v692_v25  ;;  %v693_v17 = vsel %vm326_vm11, %v688_v8, %v690_v12 }
 0x170   :  { %v698_v5 = vadd.f32 %v694_v28, %v678_v7  ;;  %v697_v16 = vadd.f32 %v693_v17, %v677_v13  ;;  %v937_v13 = vstv %s1428_s1  ;;  %s2349_s1 = sld [smem:[#allocation7 + $0xf]] }
 0x172   :  { %v704_v63 = vadd.f32 %v702_v0, %v698_v5  ;;  %v703_v11 = vadd.f32 %v701_v27, %v697_v16  ;;  %v969_v27 = vstv %s1431_s3  ;;  %s2362_s3 = sld [smem:[#allocation7 + $0x11]] }
 0x173   :  { %v755_v29 = vld [vmem:[#allocation1] sm:$0xff] }
 0x174   :  { %757 = vst [vmem:[#allocation2 + $0x2] sm:$0xf] %v755_v29  ;;  %v714_v21 = vadd.f32 %v712_v62, %v704_v63  ;;  %v713_v26 = vadd.f32 %v711_v20, %v703_v11  ;;  %v916_v62 = vstv %s1425_s7  ;;  %v999_v29 = vstv %s1434_s4  ;;  %s2331_s7 = sld [smem:[#allocation7 + $0xb]] }
 0x175   :  { %s1453_s4 = sld [smem:[#allocation7 + $0x20]] }
 0x176   :  { %v716_v33 = vmax.f32 %v714_v21, 0.0  ;;  %v715_v36 = vmax.f32 %v713_v26, 0.0 }
 0x178   :  { %v731_v31 = vrot.slane %v716_v33, 7 }
 0x17a   :  { %v732_v41 = vsel %vm720_vm12, %v715_v36, %v731_v31  ;;  %v733_v19 = vsel %vm722_vm13, %v715_v36, %v731_v31 }
 0x17b   :  { %v737_v51 = vadd.f32 %v1376_v14, %v732_v41  ;;  %v734_v55 = vrot.slane %v733_v19, 1  ;;  %v770_v40 = vld [vmem:[#allocation2] sm:$0x3f]  ;;  %v1020_v14 = vstv %s1437_s8  ;;  %s1450_s8 = sld [smem:[#allocation7 + $0x1d]] }
 0x17c   :  { %v2051_v30 = vld [vmem:[#allocation2] sm:$0x3f] }
 0x17d   :  { %1419 = vst.msk [vmem:[%s2447_s5 + $0x1] ss:$4 sm:$0x3] %vm2006_vm14, %v737_v51  ;;  %v738_v10 = vadd.f32 %v1377_v34, %v734_v55  ;;  %v806_v49 = vld [vmem:[#allocation2] sm:$0x3f]  ;;  %v887_v43 = vmul.f32 %v886_v60, %v2051_v30  ;;  %v970_v5 = vmul.f32 %v969_v27, %v2051_v30 }
 0x17e   :  { %760 = vst [vmem:[#allocation1] ss:$2 sm:$0xff] %v737_v51  ;;  %v825_v22 = vld [vmem:[#allocation2 + $0x2] sm:$0x3f] }
 0x17f   :  { %1420 = vst.msk [vmem:[%s2447_s5 + $0x9] ss:$4 sm:$0x3] %vm2006_vm14, %v738_v10  ;;  %v843_v38 = vld [vmem:[#allocation2 + $0x2] sm:$0x3f] }
 0x180   :  { %762 = vst [vmem:[#allocation1 + $0x1] ss:$2 sm:$0xff] %v738_v10  ;;  %v861_v59 = vld [vmem:[#allocation2 + $0x2] sm:$0x3f] }
 0x181   :  { %v824_v8 = vld [vmem:[#allocation2 + $0x2] sm:$0xf]  ;;  %v938_v28 = vmul.f32 %v937_v13, %v861_v59  ;;  %v1021_v36 = vmul.f32 %v1020_v14, %v861_v59 }
 0x182   :  { %v917_v57 = vmul.f32 %v916_v62, %v824_v8  ;;  %v1000_v21 = vmul.f32 %v999_v29, %v824_v8 }
 0x187   :  { %v763_v56 = vld [vmem:[#allocation1] sm:$0xff] }
 0x188   :  { %772 = vst [vmem:[#allocation1] ss:$4 sm:$0xff] %v770_v40 }
 0x189   :  { %765 = vst [vmem:[#allocation2 + $0xa] sm:$0xf] %v763_v56 }
 0x18f   :  { %v775_v47 = vld.sshfl [vmem:[#allocation1 + $0x10] sm:$0xff pattern:$0x73625140]  ;;  %v774_v50 = vld.sshfl [vmem:[#allocation1 + $0x8] sm:$0xff pattern:$0x73625140] }
 0x190   :  { %780 = vrot.lane.b32.xlu2 %v775_v47, %s1533_s13  ;;  %778 = vrot.lane.b32.xlu1 %v774_v50, %s1533_s13  ;;  %v773_v20 = vld.sshfl [vmem:[#allocation1] sm:$0xff pattern:$0x73625140]  ;;  %v1045_v55 = vld [vmem:[#allocation2 + $0x8] sm:$0x3f] }
 0x191   :  { %776 = vrot.lane.b32.xlu0 %v773_v20, %s1533_s13  ;;  %790 = vst [vmem:[#allocation1] ss:$4 sm:$0xff] %v2051_v30  ;;  %v2092_v47 = vld [vmem:[#allocation2 + $0x8] sm:$0x3f] }
 0x192   :  { %v2133_v14 = vld [vmem:[#allocation2 + $0xa] sm:$0x3f] }
 0x198   :  { %v793_v45 = vld.sshfl [vmem:[#allocation1 + $0x10] sm:$0xff pattern:$0x73625140]  ;;  %v792_v58 = vld.sshfl [vmem:[#allocation1 + $0x8] sm:$0xff pattern:$0x73625140] }
 0x199   :  { %798 = vrot.lane.b32.xlu2 %v793_v45, %s1534_s14  ;;  %796 = vrot.lane.b32.xlu1 %v792_v58, %s1534_s14  ;;  %v791_v46 = vld.sshfl [vmem:[#allocation1] sm:$0xff pattern:$0x73625140] }
 0x19a   :  { %794 = vrot.lane.b32.xlu0 %v791_v46, %s1534_s14  ;;  %808 = vst [vmem:[#allocation1] ss:$4 sm:$0xff] %v806_v49  ;;  %v1081_v46 = vld [vmem:[#allocation2 + $0x8] sm:$0x3f] }
 0x1a1   :  { %v811_v24 = vld.sshfl [vmem:[#allocation1 + $0x10] sm:$0xff pattern:$0x73625140]  ;;  %v810_v54 = vld.sshfl [vmem:[#allocation1 + $0x8] sm:$0xff pattern:$0x73625140] }
 0x1a2   :  { %816 = vrot.lane.b32.xlu2 %v811_v24, %s1535_s15  ;;  %814 = vrot.lane.b32.xlu1 %v810_v54, %s1535_s15  ;;  %v809_v18 = vld.sshfl [vmem:[#allocation1] sm:$0xff pattern:$0x73625140] }
 0x1a3   :  { %812 = vrot.lane.b32.xlu0 %v809_v18, %s1535_s15  ;;  %827 = vst [vmem:[#allocation1] ss:$4 sm:$0xff] %v825_v22 }
 0x1aa   :  { %v830_v42 = vld.sshfl [vmem:[#allocation1 + $0x10] sm:$0xff pattern:$0x73625140]  ;;  %v829_v32 = vld.sshfl [vmem:[#allocation1 + $0x8] sm:$0xff pattern:$0x73625140] }
 0x1ab   :  { %835 = vrot.lane.b32.xlu2 %v830_v42, %s1536_s16  ;;  %833 = vrot.lane.b32.xlu1 %v829_v32, %s1536_s16  ;;  %v828_v37 = vld.sshfl [vmem:[#allocation1] sm:$0xff pattern:$0x73625140] }
 0x1ac   :  { %831 = vrot.lane.b32.xlu0 %v828_v37, %s1536_s16  ;;  %845 = vst [vmem:[#allocation1] ss:$4 sm:$0xff] %v843_v38  ;;  %v1100_v37 = vld [vmem:[#allocation2 + $0xa] sm:$0x3f] }
 0x1b3   :  { %v848_v44 = vld.sshfl [vmem:[#allocation1 + $0x10] sm:$0xff pattern:$0x73625140]  ;;  %v847_v23 = vld.sshfl [vmem:[#allocation1 + $0x8] sm:$0xff pattern:$0x73625140] }
 0x1b4   :  { %853 = vrot.lane.b32.xlu2 %v848_v44, %s1537_s18  ;;  %851 = vrot.lane.b32.xlu1 %v847_v23, %s1537_s18  ;;  %v846_v61 = vld.sshfl [vmem:[#allocation1] sm:$0xff pattern:$0x73625140] }
 0x1b5   :  { %849 = vrot.lane.b32.xlu0 %v846_v61, %s1537_s18  ;;  %863 = vst [vmem:[#allocation1] ss:$4 sm:$0xff] %v861_v59 }
 0x1bc   :  { %v866_v48 = vld.sshfl [vmem:[#allocation1 + $0x10] sm:$0xff pattern:$0x73625140]  ;;  %v865_v15 = vld.sshfl [vmem:[#allocation1 + $0x8] sm:$0xff pattern:$0x73625140] }
 0x1bd   :  { %871 = vrot.lane.b32.xlu2 %v866_v48, %s1538_s20  ;;  %869 = vrot.lane.b32.xlu1 %v865_v15, %s1538_s20  ;;  %v864_v9 = vld.sshfl [vmem:[#allocation1] sm:$0xff pattern:$0x73625140] }
 0x1be   :  { %867 = vrot.lane.b32.xlu0 %v864_v9, %s1538_s20  ;;  %889 = vst [vmem:[#allocation1] ss:$4 sm:$0xff] %v887_v43  ;;  %v1118_v43 = vld [vmem:[#allocation2 + $0xa] sm:$0x3f] }
 0x1c5   :  { %v892_v25 = vld.sshfl [vmem:[#allocation1 + $0x10] sm:$0xff pattern:$0x73625140]  ;;  %v891_v7 = vld.sshfl [vmem:[#allocation1 + $0x8] sm:$0xff pattern:$0x73625140] }
 0x1c6   :  { %897 = vrot.lane.b32.xlu2 %v892_v25, %s1539_s22  ;;  %895 = vrot.lane.b32.xlu1 %v891_v7, %s1539_s22  ;;  %v890_v12 = vld.sshfl [vmem:[#allocation1] sm:$0xff pattern:$0x73625140] }
 0x1c7   :  { %893 = vrot.lane.b32.xlu0 %v890_v12, %s1539_s22  ;;  %919 = vst [vmem:[#allocation1] ss:$4 sm:$0xff] %v917_v57 }
 0x1ce   :  { %v2074_v17 = vld.sshfl [vmem:[#allocation1] sm:$0xff pattern:$0x73625140]  ;;  %v2076_v0 = vld.sshfl [vmem:[#allocation1 + $0x8] sm:$0xff pattern:$0x73625140] }
 0x1cf   :  { %940 = vst [vmem:[#allocation1] ss:$4 sm:$0xff] %v938_v28 }
 0x1d6   :  { %v943_v16 = vld.sshfl [vmem:[#allocation1 + $0x10] sm:$0xff pattern:$0x73625140]  ;;  %v942_v63 = vld.sshfl [vmem:[#allocation1 + $0x8] sm:$0xff pattern:$0x73625140] }
 0x1d7   :  { %948 = vrot.lane.b32.xlu2 %v943_v16, %s1540_s25  ;;  %946 = vrot.lane.b32.xlu1 %v942_v63, %s1540_s25  ;;  %v941_v11 = vld.sshfl [vmem:[#allocation1] sm:$0xff pattern:$0x73625140] }
 0x1d8   :  { %944 = vrot.lane.b32.xlu0 %v941_v11, %s1540_s25  ;;  %972 = vst [vmem:[#allocation1] ss:$4 sm:$0xff] %v970_v5 }
 0x1df   :  { %v975_v26 = vld.sshfl [vmem:[#allocation1 + $0x10] sm:$0xff pattern:$0x73625140]  ;;  %v974_v33 = vld.sshfl [vmem:[#allocation1 + $0x8] sm:$0xff pattern:$0x73625140] }
 0x1e0   :  { %980 = vrot.lane.b32.xlu2 %v975_v26, %s1539_s22  ;;  %978 = vrot.lane.b32.xlu1 %v974_v33, %s1539_s22  ;;  %v973_v31 = vld.sshfl [vmem:[#allocation1] sm:$0xff pattern:$0x73625140]  ;;  %v927_v26 = vstv %s2116_s9 }
 0x1e1   :  { %976 = vrot.lane.b32.xlu0 %v973_v31, %s1539_s22  ;;  %1002 = vst [vmem:[#allocation1] ss:$4 sm:$0xff] %v1000_v21 }
 0x1e8   :  { %v2085_v41 = vld.sshfl [vmem:[#allocation1] sm:$0xff pattern:$0x73625140]  ;;  %v2087_v19 = vld.sshfl [vmem:[#allocation1 + $0x8] sm:$0xff pattern:$0x73625140] }
 0x1e9   :  { %1023 = vst [vmem:[#allocation1] ss:$4 sm:$0xff] %v1021_v36 }
 0x1ea   :  { %v781_v30 = vpop.permute.xlu2 %780 }
 0x1f0   :  { %v1026_v51 = vld.sshfl [vmem:[#allocation1 + $0x10] sm:$0xff pattern:$0x73625140]  ;;  %v1025_v34 = vld.sshfl [vmem:[#allocation1 + $0x8] sm:$0xff pattern:$0x73625140] }
 0x1f1   :  { %1031 = vrot.lane.b32.xlu2 %v1026_v51, %s1540_s25  ;;  %1029 = vrot.lane.b32.xlu1 %v1025_v34, %s1540_s25  ;;  %v1024_v10 = vld.sshfl [vmem:[#allocation1] sm:$0xff pattern:$0x73625140] }
 0x1f2   :  { %1027 = vrot.lane.b32.xlu0 %v1024_v10, %s1540_s25  ;;  %1047 = vst [vmem:[#allocation1] ss:$4 sm:$0xff] %v1045_v55 }
 0x1f3   :  { %v799_v18 = vpop.permute.xlu2 %798 }
 0x1f9   :  { %v1050_v56 = vld.sshfl [vmem:[#allocation1 + $0x10] sm:$0xff pattern:$0x73625140]  ;;  %v1049_v40 = vld.sshfl [vmem:[#allocation1 + $0x8] sm:$0xff pattern:$0x73625140] }
 0x1fa   :  { %1055 = vrot.lane.b32.xlu2 %v1050_v56, %s1533_s13  ;;  %1053 = vrot.lane.b32.xlu1 %v1049_v40, %s1533_s13  ;;  %v1048_v50 = vld.sshfl [vmem:[#allocation1] sm:$0xff pattern:$0x73625140] }
 0x1fb   :  { %1051 = vrot.lane.b32.xlu0 %v1048_v50, %s1533_s13  ;;  %1065 = vst [vmem:[#allocation1] ss:$4 sm:$0xff] %v2092_v47  ;;  %s1424_s13 = sld [smem:[#allocation7 + $0x3]] }
 0x1fc   :  { %v817_v60 = vpop.permute.xlu2 %816 }
 0x201   :  { %v912_v7 = vstv %s1424_s13  ;;  %s1454_s13 = sld [smem:[#allocation7 + $0x21]] }
 0x202   :  { %v779_v20 = vpop.permute.xlu1 %778  ;;  %v1068_v58 = vld.sshfl [vmem:[#allocation1 + $0x10] sm:$0xff pattern:$0x73625140]  ;;  %v1067_v49 = vld.sshfl [vmem:[#allocation1 + $0x8] sm:$0xff pattern:$0x73625140] }
 0x203   :  { %v2099_v45 = vsel %vm151_vm1, %v779_v20, %v781_v30  ;;  %1073 = vrot.lane.b32.xlu2 %v1068_v58, %s1534_s14  ;;  %1071 = vrot.lane.b32.xlu1 %v1067_v49, %s1534_s14  ;;  %v1066_v24 = vld.sshfl [vmem:[#allocation1] sm:$0xff pattern:$0x73625140]  ;;  %v777_v54 = vpop.permute.xlu0 %776 }
 0x204   :  { %1069 = vrot.lane.b32.xlu0 %v1066_v24, %s1534_s14  ;;  %1083 = vst [vmem:[#allocation1] ss:$4 sm:$0xff] %v1081_v46  ;;  %v2105_v22 = vsel %vm151_vm1, %v777_v54, %v779_v20  ;;  %s1433_s14 = sld [smem:[#allocation7 + $0x15]] }
 0x205   :  { %v836_v28 = vpop.permute.xlu2 %835 }
 0x20a   :  { %v995_v13 = vstv %s1433_s14  ;;  %s1456_s14 = sld [smem:[#allocation7 + $0x23]] }
 0x20b   :  { %v1086_v42 = vld.sshfl [vmem:[#allocation1 + $0x10] sm:$0xff pattern:$0x73625140]  ;;  %v1085_v32 = vld.sshfl [vmem:[#allocation1 + $0x8] sm:$0xff pattern:$0x73625140]  ;;  %v797_v38 = vpop.permute.xlu1 %796 }
 0x20c   :  { %1091 = vrot.lane.b32.xlu2 %v1086_v42, %s1535_s15  ;;  %1089 = vrot.lane.b32.xlu1 %v1085_v32, %s1535_s15  ;;  %v1084_v44 = vld.sshfl [vmem:[#allocation1] sm:$0xff pattern:$0x73625140]  ;;  %v2110_v23 = vsel %vm170_vm0, %v797_v38, %v799_v18  ;;  %v795_v59 = vpop.permute.xlu0 %794  ;;  %v1161_v18 = vstv %s2128_s10 }
 0x20d   :  { %1087 = vrot.lane.b32.xlu0 %v1084_v44, %s1535_s15  ;;  %1102 = vst [vmem:[#allocation1] ss:$4 sm:$0xff] %v1100_v37  ;;  %v2114_v61 = vsel %vm170_vm0, %v795_v59, %v797_v38  ;;  %s2121_s15 = sld [smem:[#allocation7 + $0x17]]  ;;  %v1162_v38 = vmul.f32 %v1161_v18, %v2092_v47 }
 0x213   :  { %v1010_v33 = vstv %s2121_s15 }
 0x214   :  { %v1105_v48 = vld.sshfl [vmem:[#allocation1 + $0x10] sm:$0xff pattern:$0x73625140]  ;;  %v1103_v15 = vld.sshfl [vmem:[#allocation1] sm:$0xff pattern:$0x73625140]  ;;  %v815_v9 = vpop.permute.xlu1 %814 }
 0x215   :  { %1110 = vrot.lane.b32.xlu1 %v1105_v48, %s1536_s16  ;;  %1106 = vrot.lane.b32.xlu0 %v1103_v15, %s1536_s16  ;;  %v1104_v62 = vld.sshfl [vmem:[#allocation1 + $0x8] sm:$0xff pattern:$0x73625140]  ;;  %v819_v8 = vsel %vm189_vm2, %v815_v9, %v817_v60  ;;  %v813_v57 = vpop.permute.xlu0 %812  ;;  %v2168_v15 = vld [vmem:[#allocation2 + $0xa] sm:$0xf] }
 0x216   :  { %1120 = vst [vmem:[#allocation1] ss:$4 sm:$0xff] %v1118_v43  ;;  %v818_v25 = vsel %vm189_vm2, %v813_v57, %v815_v9  ;;  %v823_v12 = vsel %vm1686_vm4, %v819_v8, 0.0 }
 0x217   :  { %v822_v27 = vsel %vm1677_vm3, %v818_v25, 0.0  ;;  %v914_v5 = vmul.f32 %v912_v7, %v823_v12  ;;  %v997_v16 = vmul.f32 %v995_v13, %v823_v12 }
 0x218   :  { %v913_v29 = vmul.f32 %v912_v7, %v822_v27  ;;  %v996_v21 = vmul.f32 %v995_v13, %v822_v27  ;;  %v2182_v27 = vsel %vm1686_vm4, %v2099_v45, 0.0  ;;  %v2198_v45 = vsel %vm1700_vm6, %v2110_v23, 0.0 }
 0x219   :  { %v925_v55 = vadd.f32 %v2076_v0, %v914_v5  ;;  %v1008_v40 = vadd.f32 %v2087_v19, %v997_v16  ;;  %v854_v19 = vpop.permute.xlu2 %853  ;;  %v2188_v16 = vsel %vm1677_vm3, %v2105_v22, 0.0  ;;  %v2203_v22 = vsel %vm1705_vm7, %v2114_v61, 0.0 }
 0x21a   :  { %v924_v58 = vadd.f32 %v2074_v17, %v913_v29  ;;  %v1007_v49 = vadd.f32 %v2085_v41, %v996_v21 }
 0x21d   :  { %1108 = vrot.lane.b32.xlu0 %v1104_v62, %s1536_s16  ;;  %v1123_v63 = vld.sshfl [vmem:[#allocation1 + $0x10] sm:$0xff pattern:$0x73625140]  ;;  %v1122_v11 = vld.sshfl [vmem:[#allocation1 + $0x8] sm:$0xff pattern:$0x73625140]  ;;  %v834_v31 = vpop.permute.xlu1 %833 }
 0x21e   :  { %1128 = vrot.lane.b32.xlu2 %v1123_v63, %s1537_s18  ;;  %1126 = vrot.lane.b32.xlu1 %v1122_v11, %s1537_s18  ;;  %v1121_v36 = vld.sshfl [vmem:[#allocation1] sm:$0xff pattern:$0x73625140]  ;;  %v838_v51 = vsel %vm209_vm5, %v834_v31, %v836_v28  ;;  %v832_v34 = vpop.permute.xlu0 %831  ;;  %s1443_s16 = sld [smem:[#allocation7 + $0xd]]  ;;  %v880_v28 = vstv %s879_s11  ;;  %v1216_v63 = vstv %s1446_s12 }
 0x21f   :  { %1138 = vst [vmem:[#allocation1] ss:$4 sm:$0xff] %v2133_v14  ;;  %v842_v10 = vsel %vm1700_vm6, %v838_v51, 0.0  ;;  %v837_v56 = vsel %vm209_vm5, %v832_v34, %v834_v31  ;;  %v882_v11 = vmul.f32 %v880_v28, %v2182_v27  ;;  %v881_v29 = vmul.f32 %v880_v28, %v2188_v16 }
 0x220   :  { %v929_v50 = vmul.f32 %v927_v26, %v842_v10  ;;  %v1012_v30 = vmul.f32 %v1010_v33, %v842_v10  ;;  %v841_v20 = vsel %vm1705_vm7, %v837_v56, 0.0 }
 0x221   :  { %v928_v46 = vmul.f32 %v927_v26, %v841_v20  ;;  %v1011_v0 = vmul.f32 %v1010_v33, %v841_v20  ;;  %v872_v9 = vpop.permute.xlu2 %871  ;;  %v1217_v26 = vmul.f32 %v1216_v63, %v2133_v14  ;;  %v906_v33 = vstv %s2172_s17 }
 0x222   :  { %v2148_v24 = vadd.f32 %v929_v50, %v925_v55  ;;  %v2150_v54 = vadd.f32 %v1012_v30, %v1008_v40  ;;  %v908_v40 = vmul.f32 %v906_v33, %v2198_v45  ;;  %v907_v30 = vmul.f32 %v906_v33, %v2203_v22 }
 0x223   :  { %v2153_v42 = vadd.f32 %v928_v46, %v924_v58  ;;  %v2155_v32 = vadd.f32 %v1011_v0, %v1007_v49  ;;  %v1248_v49 = vstv %s1449_s19  ;;  %v1303_v33 = vstv %s2227_s27 }
 0x224   :  { %v1193_v48 = vstv %s1443_s16  ;;  %v1249_v0 = vmul.f32 %v1248_v49, %v2092_v47 }
 0x225   :  { %v1194_v62 = vmul.f32 %v1193_v48, %v2168_v15 }
 0x226   :  { %1124 = vrot.lane.b32.xlu2 %v1121_v36, %s1537_s18  ;;  %v1140_v17 = vld.sshfl [vmem:[#allocation1 + $0x8] sm:$0xff pattern:$0x73625140]  ;;  %v1141_v37 = vld.sshfl [vmem:[#allocation1 + $0x10] sm:$0xff pattern:$0x73625140]  ;;  %v852_v41 = vpop.permute.xlu1 %851 }
 0x227   :  { %1144 = vrot.lane.b32.xlu1 %v1140_v17, %s1538_s20  ;;  %v2160_v44 = vld.sshfl [vmem:[#allocation1] sm:$0xff pattern:$0x73625140]  ;;  %v2163_v59 = vsel %vm228_vm9, %v852_v41, %v854_v19  ;;  %v850_v60 = vpop.permute.xlu0 %849  ;;  %s2170_s18 = sld [smem:[#allocation8]]  ;;  %v1280_v17 = vstv %s1452_s21 }
 0x228   :  { %1164 = vst [vmem:[#allocation1] ss:$4 sm:$0xff] %v1162_v38  ;;  %v2166_v43 = vsel %vm228_vm9, %v850_v60, %v852_v41  ;;  %v860_v41 = vsel %vm1686_vm4, %v2163_v59, 0.0  ;;  %v957_v60 = vstv %s2218_s24 }
 0x229   :  { %v898_v31 = vpop.permute.xlu2 %897  ;;  %v2235_v47 = vsel %vm1677_vm3, %v2166_v43, 0.0 }
 0x22d   :  { %v767_v21 = vstv %s2170_s18 }
 0x22e   :  { %1146 = vrot.lane.b32.xlu2 %v1141_v37, %s1538_s20  ;;  %v884_v34 = vadd.f32 %v882_v11, %v767_v21  ;;  %v883_v56 = vadd.f32 %v881_v29, %v767_v21  ;;  %v933_v37 = vstv %s1427_s23 }
 0x22f   :  { %v1167_v8 = vld.sshfl [vmem:[#allocation1 + $0x10] sm:$0xff pattern:$0x73625140]  ;;  %v1166_v57 = vld.sshfl [vmem:[#allocation1 + $0x8] sm:$0xff pattern:$0x73625140]  ;;  %v870_v25 = vpop.permute.xlu1 %869 }
 0x230   :  { %1172 = vrot.lane.b32.xlu1 %v1167_v8, %s1539_s22  ;;  %1170 = vrot.lane.b32.xlu0 %v1166_v57, %s1539_s22  ;;  %v1165_v7 = vld.sshfl [vmem:[#allocation1] sm:$0xff pattern:$0x73625140]  ;;  %v874_v12 = vsel %vm247_vm8, %v870_v25, %v872_v9  ;;  %v868_v13 = vpop.permute.xlu0 %867  ;;  %v935_v8 = vmul.f32 %v933_v37, %v860_v41 }
 0x231   :  { %1196 = vst [vmem:[#allocation1] ss:$4 sm:$0xff] %v1194_v62  ;;  %v873_v5 = vsel %vm247_vm8, %v868_v13, %v870_v25  ;;  %v2244_v48 = vsel %vm1700_vm6, %v874_v12, 0.0  ;;  %v949_v59 = vpop.permute.xlu2 %948  ;;  %v1281_v62 = vmul.f32 %v1280_v17, %v2168_v15 }
 0x232   :  { %v2248_v9 = vsel %vm1705_vm7, %v873_v5, 0.0  ;;  %v963_v5 = vstv %s2225_s26  ;;  %v959_v15 = vmul.f32 %v957_v60, %v2244_v48 }
 0x233   :  { %v958_v29 = vmul.f32 %v957_v60, %v2248_v9 }
 0x238   :  { %1168 = vrot.lane.b32.xlu0 %v1165_v7, %s1539_s22  ;;  %v2206_v36 = vld.sshfl [vmem:[#allocation1] sm:$0xff pattern:$0x73625140]  ;;  %v2208_v51 = vld.sshfl [vmem:[#allocation1 + $0x8] sm:$0xff pattern:$0x73625140]  ;;  %v896_v55 = vpop.permute.xlu1 %895  ;;  %v934_v7 = vmul.f32 %v933_v37, %v2235_v47 }
 0x239   :  { %1219 = vst [vmem:[#allocation1] ss:$4 sm:$0xff] %v1217_v26  ;;  %v900_v10 = vsel %vm274_vm10, %v896_v55, %v898_v31  ;;  %v894_v23 = vpop.permute.xlu0 %893  ;;  %v965_v31 = vmul.f32 %v963_v5, %v2182_v27 }
 0x23a   :  { %v904_v50 = vadd.f32 %v900_v10, %v884_v34  ;;  %v899_v61 = vsel %vm274_vm10, %v894_v23, %v896_v55  ;;  %v964_v55 = vmul.f32 %v963_v5, %v2188_v16  ;;  %v769_v10 = vstv %s2237_s28 }
 0x23b   :  { %v903_v20 = vadd.f32 %v899_v61, %v883_v56  ;;  %v1304_v56 = vmul.f32 %v1303_v33, %v2133_v14  ;;  %v989_v23 = vstv %s2239_s29 }
 0x23c   :  { %v2214_v58 = vadd.f32 %v908_v40, %v904_v50  ;;  %v981_v40 = vpop.permute.xlu2 %980  ;;  %v966_v49 = vadd.f32 %v964_v55, %v769_v10  ;;  %v991_v16 = vmul.f32 %v989_v23, %v2198_v45 }
 0x23d   :  { %v2216_v46 = vadd.f32 %v907_v30, %v903_v20  ;;  %v967_v30 = vadd.f32 %v965_v31, %v769_v10 }
 0x240   :  { %v1222_v18 = vld.sshfl [vmem:[#allocation1 + $0x10] sm:$0xff pattern:$0x73625140]  ;;  %v1221_v19 = vld.sshfl [vmem:[#allocation1 + $0x8] sm:$0xff pattern:$0x73625140] }
 0x241   :  { %1227 = vrot.lane.b32.xlu2 %v1222_v18, %s1540_s25  ;;  %1225 = vrot.lane.b32.xlu1 %v1221_v19, %s1540_s25  ;;  %v2223_v38 = vld.sshfl [vmem:[#allocation1] sm:$0xff pattern:$0x73625140]  ;;  %v990_v19 = vmul.f32 %v989_v23, %v2203_v22 }
 0x242   :  { %1251 = vst [vmem:[#allocation1] ss:$4 sm:$0xff] %v1249_v0 }
 0x249   :  { %v1254_v43 = vld.sshfl [vmem:[#allocation1 + $0x10] sm:$0xff pattern:$0x73625140]  ;;  %v1253_v57 = vld.sshfl [vmem:[#allocation1 + $0x8] sm:$0xff pattern:$0x73625140]  ;;  %v947_v25 = vpop.permute.xlu1 %946 }
 0x24a   :  { %1259 = vrot.lane.b32.xlu0 %v1254_v43, %s1539_s22  ;;  %1257 = vrot.lane.b32.xlu2 %v1253_v57, %s1539_s22  ;;  %v1252_v12 = vld.sshfl [vmem:[#allocation1] sm:$0xff pattern:$0x73625140]  ;;  %v951_v13 = vsel %vm326_vm11, %v947_v25, %v949_v59  ;;  %v945_v28 = vpop.permute.xlu0 %944  ;;  %v1040_v43 = vstv %s1438_s30 }
 0x24b   :  { %1283 = vst [vmem:[#allocation1] ss:$4 sm:$0xff] %v1281_v62  ;;  %v955_v63 = vadd.f32 %v951_v13, %v935_v8  ;;  %v950_v11 = vsel %vm326_vm11, %v945_v28, %v947_v25  ;;  %v1032_v8 = vpop.permute.xlu2 %1031  ;;  %v1042_v13 = vmul.f32 %v1040_v43, %v2244_v48 }
 0x24c   :  { %v954_v21 = vadd.f32 %v950_v11, %v934_v7 }
 0x24d   :  { %v2259_v26 = vadd.f32 %v959_v15, %v955_v63 }
 0x24e   :  { %v2263_v34 = vadd.f32 %v958_v29, %v954_v21  ;;  %v1242_v21 = vstv %s2293_s2 }
 0x252   :  { %1255 = vrot.lane.b32.xlu0 %v1252_v12, %s1539_s22  ;;  %v2270_v50 = vld.sshfl [vmem:[#allocation1] sm:$0xff pattern:$0x73625140]  ;;  %v2272_v61 = vld.sshfl [vmem:[#allocation1 + $0x8] sm:$0xff pattern:$0x73625140]  ;;  %v979_v20 = vpop.permute.xlu1 %978 }
 0x253   :  { %1306 = vst [vmem:[#allocation1] ss:$4 sm:$0xff] %v1304_v56  ;;  %v983_v27 = vsel %vm274_vm10, %v979_v20, %v981_v40  ;;  %v977_v0 = vpop.permute.xlu0 %976  ;;  %s1436_s22 = sld [smem:[#allocation7 + $0x18]] }
 0x254   :  { %v987_v18 = vadd.f32 %v983_v27, %v967_v30  ;;  %v982_v14 = vsel %vm274_vm10, %v977_v0, %v979_v20  ;;  %v1056_v63 = vpop.permute.xlu2 %1055 }
 0x255   :  { %v986_v17 = vadd.f32 %v982_v14, %v966_v49 }
 0x256   :  { %v2278_v37 = vadd.f32 %v991_v16, %v987_v18 }
 0x257   :  { %v992_v60 = vadd.f32 %v990_v19, %v986_v17 }
 0x259   :  { %v1016_v45 = vstv %s1436_s22 }
 0x25a   :  { %1142 = vrot.lane.b32.xlu0 %v2160_v44, %s1538_s20  ;;  %v1309_v59 = vld.sshfl [vmem:[#allocation1 + $0x10] sm:$0xff pattern:$0x73625140]  ;;  %v1308_v62 = vld.sshfl [vmem:[#allocation1 + $0x8] sm:$0xff pattern:$0x73625140]  ;;  %v1018_v22 = vmul.f32 %v1016_v45, %v860_v41  ;;  %v1017_v7 = vmul.f32 %v1016_v45, %v2235_v47 }
 0x25b   :  { %1314 = vrot.lane.b32.xlu2 %v1309_v59, %s1540_s25  ;;  %1312 = vrot.lane.b32.xlu1 %v1308_v62, %s1540_s25  ;;  %v1307_v57 = vld.sshfl [vmem:[#allocation1] sm:$0xff pattern:$0x73625140]  ;;  %s2289_s20 = sld [smem:[#allocation7 + $0x9]] }
 0x25d   :  { %v1074_v23 = vpop.permute.xlu2 %1073 }
 0x261   :  { %v1155_v29 = vstv %s2289_s20 }
 0x263   :  { %1223 = vrot.lane.b32.xlu1 %v2223_v38, %s1540_s25  ;;  %1310 = vrot.lane.b32.xlu2 %v1307_v57, %s1540_s25  ;;  %v1030_v25 = vpop.permute.xlu1 %1029  ;;  %v1041_v38 = vmul.f32 %v1040_v43, %v2248_v9  ;;  %s1451_s25 = sld [smem:[#allocation7 + $0x1e]] }
 0x264   :  { %v1034_v44 = vsel %vm326_vm11, %v1030_v25, %v1032_v8  ;;  %v1028_v12 = vpop.permute.xlu0 %1027 }
 0x265   :  { %v1038_v28 = vadd.f32 %v1034_v44, %v1018_v22  ;;  %v1033_v5 = vsel %vm326_vm11, %v1028_v12, %v1030_v25 }
 0x266   :  { %v1037_v41 = vadd.f32 %v1033_v5, %v1017_v7  ;;  %v1092_v20 = vpop.permute.xlu2 %1091  ;;  %v1204_v5 = vstv %s2328_s0 }
 0x267   :  { %v2296_v15 = vadd.f32 %v1042_v13, %v1038_v28 }
 0x268   :  { %v2298_v47 = vadd.f32 %v1041_v38, %v1037_v41  ;;  %v1181_v41 = vstv %s2331_s7 }
 0x269   :  { %v1274_v27 = vstv %s1451_s25 }
 0x26c   :  { %v1054_v11 = vpop.permute.xlu1 %1053 }
 0x26d   :  { %v1052_v33 = vpop.permute.xlu0 %1051  ;;  %v1058_v25 = vsel %vm151_vm1, %v1054_v11, %v1056_v63 }
 0x26e   :  { %v1057_v48 = vsel %vm151_vm1, %v1052_v33, %v1054_v11 }
 0x26f   :  { %v1061_v31 = vsel %vm1677_vm3, %v1057_v48, 0.0 }
 0x270   :  { %v1156_v55 = vmul.f32 %v1155_v29, %v1061_v31  ;;  %v1243_v10 = vmul.f32 %v1242_v21, %v1061_v31 }
 0x272   :  { %v2308_v9 = vadd.f32 %v1156_v55, %v2216_v46  ;;  %v2310_v56 = vadd.f32 %v1243_v10, %v992_v60 }
 0x275   :  { %v1072_v40 = vpop.permute.xlu1 %1071 }
 0x276   :  { %v1070_v30 = vpop.permute.xlu0 %1069  ;;  %v1076_v12 = vsel %vm170_vm0, %v1072_v40, %v1074_v23 }
 0x277   :  { %v1080_v63 = vsel %vm1700_vm6, %v1076_v12, 0.0  ;;  %v1236_v12 = vstv %s2362_s3 }
 0x278   :  { %v1129_v22 = vpop.permute.xlu2 %1128  ;;  %v1183_v10 = vmul.f32 %v1181_v41, %v1080_v63 }
 0x27e   :  { %v1090_v49 = vpop.permute.xlu1 %1089 }
 0x27f   :  { %v1094_v0 = vsel %vm189_vm2, %v1090_v49, %v1092_v20  ;;  %v1088_v16 = vpop.permute.xlu0 %1087 }
 0x280   :  { %v1098_v18 = vsel %vm1686_vm4, %v1094_v0, 0.0  ;;  %v1093_v14 = vsel %vm189_vm2, %v1088_v16, %v1090_v49  ;;  %v2339_v28 = vpop.permute.xlu2 %1124  ;;  %v1075_v0 = vsel %vm170_vm0, %v1070_v30, %v1072_v40  ;;  %v1210_v30 = vstv %s2349_s1 }
 0x281   :  { %v1276_v19 = vmul.f32 %v1274_v27, %v1098_v18  ;;  %v1097_v46 = vsel %vm1677_vm3, %v1093_v14, 0.0 }
 0x282   :  { %v1275_v17 = vmul.f32 %v1274_v27, %v1097_v46 }
 0x283   :  { %v1278_v60 = vadd.f32 %v1276_v19, %v2150_v54  ;;  %v1187_v54 = vstv %s1442_s6  ;;  %v1079_v19 = vsel %vm1705_vm7, %v1075_v0, 0.0 }
 0x284   :  { %v1277_v59 = vadd.f32 %v1275_v17, %v2155_v32  ;;  %v1189_v7 = vmul.f32 %v1187_v54, %v1098_v18  ;;  %v1188_v23 = vmul.f32 %v1187_v54, %v1097_v46 }
 0x285   :  { %v2321_v62 = vadd.f32 %v2272_v61, %v1278_v60 }
 0x286   :  { %v2324_v45 = vadd.f32 %v2270_v50, %v1277_v59  ;;  %v1062_v50 = vsel %vm1686_vm4, %v1058_v25, 0.0  ;;  %v1191_v11 = vadd.f32 %v1189_v7, %v2148_v24  ;;  %v1190_v18 = vadd.f32 %v1188_v23, %v2153_v42 }
 0x287   :  { %v1111_v8 = vpop.permute.xlu1 %1110  ;;  %v1107_v43 = vpop.permute.xlu0 %1106  ;;  %v1157_v13 = vmul.f32 %v1155_v29, %v1062_v50  ;;  %v1182_v59 = vmul.f32 %v1181_v41, %v1079_v19 }
 0x288   :  { %v1202_v27 = vadd.f32 %v2208_v51, %v1191_v11  ;;  %v1147_v46 = vpop.permute.xlu2 %1146  ;;  %v1201_v42 = vadd.f32 %v2206_v36, %v1190_v18 }
 0x289   :  { %v1159_v31 = vadd.f32 %v1157_v13, %v2214_v58 }
 0x28f   :  { %v1109_v32 = vpop.permute.xlu0 %1108 }
 0x290   :  { %v2326_v57 = vpop.permute.xlu1 %1126  ;;  %v1113_v44 = vsel %vm209_vm5, %v1109_v32, %v1111_v8  ;;  %v1112_v20 = vsel %vm209_vm5, %v1107_v43, %v1109_v32 }
 0x291   :  { %v1117_v38 = vsel %vm1700_vm6, %v1113_v44, 0.0  ;;  %v1116_v58 = vsel %vm1705_vm7, %v1112_v20, 0.0  ;;  %v1131_v17 = vsel %vm228_vm9, %v2326_v57, %v1129_v22 }
 0x292   :  { %v1206_v33 = vmul.f32 %v1204_v5, %v1117_v38  ;;  %v1205_v51 = vmul.f32 %v1204_v5, %v1116_v58  ;;  %v1135_v8 = vsel %vm1686_vm4, %v1131_v17, 0.0 }
 0x293   :  { %v1212_v54 = vmul.f32 %v1210_v30, %v1135_v8 }
 0x294   :  { %v1208_v24 = vadd.f32 %v1206_v33, %v1202_v27  ;;  %v1207_v25 = vadd.f32 %v1205_v51, %v1201_v42  ;;  %v1244_v33 = vmul.f32 %v1242_v21, %v1062_v50  ;;  %v1130_v21 = vsel %vm228_vm9, %v2339_v28, %v2326_v57 }
 0x295   :  { %v1214_v36 = vadd.f32 %v1212_v54, %v2259_v26  ;;  %v1323_v28 = vstv %s1456_s14 }
 0x296   :  { %v1246_v52 = vadd.f32 %v1244_v33, %v2278_v37 }
 0x299   :  { %v2333_v61 = vpop.permute.xlu1 %1144 }
 0x29a   :  { %v1149_v32 = vsel %vm247_vm8, %v2333_v61, %v1147_v46 }
 0x29b   :  { %v1228_v44 = vpop.permute.xlu2 %1227  ;;  %v1153_v39 = vsel %vm1700_vm6, %v1149_v32, 0.0 }
 0x29c   :  { %v1238_v5 = vmul.f32 %v1236_v12, %v1153_v39 }
 0x2a2   :  { %v1173_v48 = vpop.permute.xlu1 %1172  ;;  %v1171_v55 = vpop.permute.xlu0 %1170 }
 0x2a3   :  { %v1175_v29 = vsel %vm274_vm10, %v1171_v55, %v1173_v48  ;;  %v1291_v48 = vstv %s1453_s4 }
 0x2a4   :  { %v1179_v49 = vadd.f32 %v1175_v29, %v1159_v31  ;;  %v1293_v29 = vmul.f32 %v1291_v48, %v1117_v38 }
 0x2a6   :  { %v1185_v16 = vadd.f32 %v1183_v10, %v1179_v49  ;;  %v1258_v10 = vpop.permute.xlu2 %1257  ;;  %v1295_v49 = vadd.f32 %v1293_v29, %v2321_v62 }
 0x2a8   :  { %v1329_v14 = vadd.f32 %v1208_v24, %v1185_v16  ;;  %v1292_v16 = vmul.f32 %v1291_v48, %v1116_v58 }
 0x2aa   :  { %v1169_v40 = vpop.permute.xlu0 %1168  ;;  %v1294_v62 = vadd.f32 %v1292_v16, %v2324_v45 }
 0x2ab   :  { %v1174_v60 = vsel %vm274_vm10, %v1169_v40, %v1171_v55  ;;  %v1268_v55 = vstv %s1450_s8 }
 0x2ac   :  { %v1178_v43 = vadd.f32 %v1174_v60, %v2308_v9  ;;  %v1270_v20 = vmul.f32 %v1268_v55, %v1080_v63  ;;  %v1269_v18 = vmul.f32 %v1268_v55, %v1079_v19  ;;  %v1134_v63 = vsel %vm1677_vm3, %v1130_v21, 0.0 }
 0x2ad   :  { %v1211_v32 = vmul.f32 %v1210_v30, %v1134_v63 }
 0x2ae   :  { %v1184_v22 = vadd.f32 %v1182_v59, %v1178_v43  ;;  %v1325_v43 = vmul.f32 %v1323_v28, %v1153_v39 }
 0x2af   :  { %v1213_v53 = vadd.f32 %v1211_v32, %v2263_v34 }
 0x2b0   :  { %v2374_v7 = vadd.f32 %v1207_v25, %v1184_v22 }
 0x2b3   :  { %v1226_v9 = vpop.permute.xlu1 %1225 }
 0x2b4   :  { %v1230_v13 = vsel %vm326_vm11, %v1226_v9, %v1228_v44 }
 0x2b5   :  { %v1234_v41 = vadd.f32 %v1230_v13, %v1214_v36  ;;  %v1315_v50 = vpop.permute.xlu2 %1314 }
 0x2b7   :  { %v1240_v11 = vadd.f32 %v1238_v5, %v1234_v41 }
 0x2b9   :  { %v2385_v31 = vadd.f32 %v1329_v14, %v1240_v11  ;;  %v1297_v14 = vstv %s1454_s13 }
 0x2ba   :  { %v1298_v51 = vmul.f32 %v1297_v14, %v1134_v63  ;;  %v1299_v40 = vmul.f32 %v1297_v14, %v1135_v8 }
 0x2bb   :  { %v1333_v48 = vmax.f32 %v2385_v31, 0.0 }
 0x2bc   :  { %v1260_v23 = vpop.permute.xlu0 %1259  ;;  %v1300_v19 = vadd.f32 %v1298_v51, %v2298_v47  ;;  %v1301_v35 = vadd.f32 %v1299_v40, %v2296_v15 }
 0x2bd   :  { %v1262_v26 = vsel %vm274_vm10, %v1258_v10, %v1260_v23  ;;  %v1311_v60 = vpop.permute.xlu2 %1310 }
 0x2be   :  { %v1266_v27 = vadd.f32 %v1262_v26, %v1246_v52 }
 0x2c0   :  { %v1272_v0 = vadd.f32 %v1270_v20, %v1266_v27 }
 0x2c2   :  { %v1335_v24 = vadd.f32 %v1295_v49, %v1272_v0 }
 0x2c4   :  { %v1256_v38 = vpop.permute.xlu0 %1255 }
 0x2c5   :  { %v1261_v37 = vsel %vm274_vm10, %v1256_v38, %v1258_v10 }
 0x2c6   :  { %v1265_v46 = vadd.f32 %v1261_v37, %v2310_v56 }
 0x2c8   :  { %v1271_v17 = vadd.f32 %v1269_v18, %v1265_v46 }
 0x2ca   :  { %v1334_v57 = vadd.f32 %v1294_v62, %v1271_v17 }
 0x2cc   :  { %v1143_v58 = vpop.permute.xlu0 %1142 }
 0x2cd   :  { %v1148_v59 = vsel %vm247_vm8, %v1143_v58, %v2333_v61  ;;  %v1313_v42 = vpop.permute.xlu1 %1312 }
 0x2ce   :  { %v1152_v56 = vsel %vm1705_vm7, %v1148_v59, 0.0  ;;  %v1316_v45 = vsel %vm326_vm11, %v1311_v60, %v1313_v42  ;;  %v1317_v8 = vsel %vm326_vm11, %v1313_v42, %v1315_v50 }
 0x2cf   :  { %v1324_v25 = vmul.f32 %v1323_v28, %v1152_v56  ;;  %v1320_v22 = vadd.f32 %v1316_v45, %v1300_v19  ;;  %v1321_v54 = vadd.f32 %v1317_v8, %v1301_v35  ;;  %v1237_v11 = vmul.f32 %v1236_v12, %v1152_v56 }
 0x2d0   :  { %v1342_v12 = vrot.slane %v1333_v48, 7 }
 0x2d1   :  { %v1326_v61 = vadd.f32 %v1324_v25, %v1320_v22  ;;  %v1327_v44 = vadd.f32 %v1325_v43, %v1321_v54 }
 0x2d3   :  { %v1336_v47 = vadd.f32 %v1334_v57, %v1326_v61  ;;  %v1337_v36 = vadd.f32 %v1335_v24, %v1327_v44 }
 0x2d5   :  { %v1338_v15 = vmax.f32 %v1336_v47, 0.0  ;;  %v1339_v13 = vmax.f32 %v1337_v36, 0.0  ;;  %v1224_v5 = vpop.permute.xlu1 %1223 }
 0x2d6   :  { %v1229_v41 = vsel %vm326_vm11, %v1224_v5, %v1226_v9 }
 0x2d7   :  { %v1356_v33 = vrot.slane %v1339_v13, 7  ;;  %v1233_v39 = vadd.f32 %v1229_v41, %v1213_v53 }
 0x2d9   :  { %v1357_v55 = vsel %vm720_vm12, %v1338_v15, %v1356_v33  ;;  %v1358_v30 = vsel %vm722_vm13, %v1338_v15, %v1356_v33  ;;  %v1239_v10 = vadd.f32 %v1237_v11, %v1233_v39 }
 0x2da   :  { %v1359_v29 = vrot.slane %v1358_v30, 1  ;;  %v1362_v52 = vadd.f32 %v1598_v3, %v1357_v55 }
 0x2db   :  { %v1330_v23 = vadd.f32 %v2374_v7, %v1239_v10 }
 0x2dc   :  { %v1363_v34 = vadd.f32 %v1603_v4, %v1359_v29  ;;  %1459 = vst.msk [vmem:[%s2447_s5 + $0x3] ss:$4 sm:$0x3] %vm2006_vm14, %v1362_v52 }
 0x2dd   :  { %v1332_v9 = vmax.f32 %v1330_v23, 0.0 }
 0x2de   :  { %1460 = vst.msk [vmem:[%s2447_s5 + $0xb] ss:$4 sm:$0x3] %vm2006_vm14, %v1363_v34 }
 0x2df   :  { %v1343_v3 = vsel %vm720_vm12, %v1332_v9, %v1342_v12  ;;  %v1344_v7 = vsel %vm722_vm13, %v1332_v9, %v1342_v12 }
 0x2e0   :  { %v1345_v31 = vrot.slane %v1344_v7, 1  ;;  %v1348_v4 = vadd.f32 %v1586_v1, %v1343_v3 }
 0x2e2   :  { %v1349_v26 = vadd.f32 %v1591_v2, %v1345_v31  ;;  %1457 = vst.msk [vmem:[%s2447_s5 + $0x2] ss:$4 sm:$0x3] %vm2006_vm14, %v1348_v4 }
 0x2e4   :  { %1458 = vst.msk [vmem:[%s2447_s5 + $0xa] ss:$4 sm:$0x3] %vm2006_vm14, %v1349_v26 }
 0x2e5   :  { %1372 = vsyncpa [#allocation4], 1 }
 0x2e6   :  { %1373 = vsyncpa [#allocation6], 1 }
 0x2e7   :  { %1374 = vsyncpa [#allocation9], 1 }

</bundles_post_ra>
